<compile_context>
chip_gen: v6e
topology: v6e:2x2x1
jax: 0.10.0
libtpu: 0.0.40
codegen_flags: <defaults>
</compile_context>

<pallas_src>
import jax
import jax.numpy as jnp
from jax.experimental import pallas as pl
from jax.experimental.pallas import tpu as pltpu


# ---------------------------------------------------------------------------
# Kernel
# ---------------------------------------------------------------------------
def _projection_head_kernel(x_ref, w1_ref, ws_ref, w2_ref, b_ref, out_ref):
    # x stays f32 in HBM/VMEM; cast only at the MXU operands.
    x = x_ref[...]                                  # f32 [bm, D]
    b = b_ref[...]                                  # f32 [8, D] packed biases
    b1, bs, b2 = b[0:1, :], b[1:2, :], b[2:3, :]

    # fc1: bf16 x bf16 -> f32 accumulate, bias added in f32.
    h = jnp.dot(x.astype(jnp.bfloat16), w1_ref[...],
                preferred_element_type=jnp.float32) + b1

    # selective_fc -> SiLU; sigmoid via one EUP tanh (f32 math).
    s = jnp.dot(h.astype(jnp.bfloat16), ws_ref[...],
                preferred_element_type=jnp.float32) + bs
    silu = s * (0.5 * jnp.tanh(0.5 * s) + 0.5)

    # SwiGLU-style gate of fc1 output (control_weight already folded into w2).
    adjusted = silu * h

    # fc2
    out = jnp.dot(adjusted.astype(jnp.bfloat16), w2_ref[...],
                  preferred_element_type=jnp.float32) + b2
    out_ref[...] = out.astype(out_ref.dtype)


# ---------------------------------------------------------------------------
# Wrapper
# ---------------------------------------------------------------------------
def _round_up(v, m):
    return ((v + m - 1) // m) * m


def _pick_bm(B, bm):
    bm_eff = min(bm, B)
    if B >= 16:
        # Keep at least 2 grid steps along the "parallel" batch axis so v7x's
        # second TensorCore has work (no-op / harmless on v5e, v6e).
        bm_eff = min(bm_eff, _round_up(pl.cdiv(B, 2), 8))
    return max(1, bm_eff)


def _build_call(B, D, bm, out_dtype, single_buffer):
    grid = (pl.cdiv(B, bm),)
    row_spec = pl.BlockSpec((bm, D), lambda i: (i, 0))

    def rep(shape):  # replicated (VMEM-resident) parameter blocks
        if single_buffer:
            return pl.BlockSpec(shape, lambda i: (0, 0),
                                pipeline_mode=pl.Buffered(1))
        return pl.BlockSpec(shape, lambda i: (0, 0))

    # Explicit VMEM budget for the fused design (the 3 DxD weights dominate).
    nbuf = 1 if single_buffer else 2
    weight_bytes = 3 * D * D * 2 * nbuf            # bf16 weights
    bias_bytes = 8 * D * 4 * nbuf                  # packed f32 biases
    act_bytes = 2 * bm * D * (4 + 4)               # x + out, double-buffered f32
    budget = int(1.5 * (weight_bytes + bias_bytes + act_bytes)) + (2 << 20)
    vmem_limit = int(min(100 << 20, max(32 << 20, budget)))

    return pl.pallas_call(
        _projection_head_kernel,
        out_shape=jax.ShapeDtypeStruct((B, D), out_dtype),
        grid=grid,
        in_specs=[
            row_spec,       # x              [bm, D]  f32
            rep((D, D)),    # fc1 weight     [in, out] bf16
            rep((D, D)),    # selective_fc weight      bf16
            rep((D, D)),    # fc2 weight (control_weight folded in) bf16
            rep((8, D)),    # packed biases (rows 0..2 = b1, bs, b2) f32
        ],
        out_specs=row_spec,
        compiler_params=pltpu.CompilerParams(
            dimension_semantics=("parallel",),
            vmem_limit_bytes=vmem_limit,
        ),
    )


def prepare_params(params):
    """One-time parameter prep: fold cw into fc2, cast weights to bf16, pack biases."""
    D = params["w1"].shape[0]
    # (selective * cw) @ w2  ==  selective @ (cw[:, None] * w2)   (exact, f32)
    w2_eff = params["w2"] * params["cw"].reshape(D, 1)
    biases = jnp.zeros((8, D), jnp.float32)
    biases = biases.at[0].set(params["b1"].reshape(D))
    biases = biases.at[1].set(params["bs"].reshape(D))
    biases = biases.at[2].set(params["b2"].reshape(D))
    return {
        "w1": params["w1"].astype(jnp.bfloat16),
        "ws": params["ws"].astype(jnp.bfloat16),
        "w2": w2_eff.astype(jnp.bfloat16),
        "biases": biases,
    }


def simclr_forward(x, prepped, *, bm=256):
    """Pallas implementation of SimCLR.forward (== CombinedProjectionHead)."""
    B, D = x.shape
    bm_eff = _pick_bm(B, bm)
    args = (x, prepped["w1"], prepped["ws"], prepped["w2"], prepped["biases"])
    try:
        return _build_call(B, D, bm_eff, x.dtype, single_buffer=True)(*args)
    except Exception:
        # Fallback for JAX versions without BlockSpec.pipeline_mode / Buffered:
        # identical kernel, default double-buffering of the replicated params.
        return _build_call(B, D, bm_eff, x.dtype, single_buffer=False)(*args)


# ---------------------------------------------------------------------------
# Parameters & references
# ---------------------------------------------------------------------------
def init_params(key, input_dim):
    """Deterministic synthetic parameters (shapes match nn.Module __init__).

    nn.Linear default init: U(-1/sqrt(fan_in)) for weight+bias.
    Weights stored transposed as [in, out].  control_weight = ones(input_dim).
    """
    ks = jax.random.split(key, 6)

    def u(k, shape, fan_in):
        bound = 1.0 / jnp.sqrt(jnp.float32(fan_in))
        return jax.random.uniform(k, shape, jnp.float32, -bound, bound)

    return {
        "w1": u(ks[0], (input_dim, input_dim), input_dim),
        "b1": u(ks[1], (1, input_dim), input_dim),
        "ws": u(ks[2], (input_dim, input_dim), input_dim),
        "bs": u(ks[3], (1, input_dim), input_dim),
        "cw": jnp.ones((1, input_dim), jnp.float32),
        "w2": u(ks[4], (input_dim, input_dim), input_dim),
        "b2": u(ks[5], (1, input_dim), input_dim),
    }


def simclr_reference(x, p):
    """Pure-JAX f32 reference mirroring the PyTorch forward."""
    h = x @ p["w1"] + p["b1"]
    selective = jax.nn.silu(h @ p["ws"] + p["bs"]) * h
    adjusted = selective * p["cw"]
    return adjusted @ p["w2"] + p["b2"]


def simclr_reference_bf16(x, p):
    """Reference mirroring the kernel's precision: bf16 MXU operands, f32 elementwise."""
    bf = jnp.bfloat16
    w2_eff = (p["w2"] * p["cw"].reshape(-1, 1)).astype(bf)
    h = jnp.dot(x.astype(bf), p["w1"].astype(bf),
                preferred_element_type=jnp.float32) + p["b1"]
    s = jnp.dot(h.astype(bf), p["ws"].astype(bf),
                preferred_element_type=jnp.float32) + p["bs"]
    silu = s * (0.5 * jnp.tanh(0.5 * s) + 0.5)
    return jnp.dot((silu * h).astype(bf), w2_eff,
                   preferred_element_type=jnp.float32) + p["b2"]


# ---------------------------------------------------------------------------
if __name__ == "__main__":
    BATCH, INPUT_DIM = 16, 256          # small, lane-aligned stand-in for 768

    key = jax.random.PRNGKey(0)
    k_x, k_p = jax.random.split(key)
    x = jax.random.normal(k_x, (BATCH, INPUT_DIM), jnp.float32)
    params = init_params(k_p, INPUT_DIM)
    prepped = prepare_params(params)    # one-time prep, off the hot path

    out = jax.block_until_ready(simclr_forward(x, prepped))

    ref_bf16 = simclr_reference_bf16(x, params)
    ref_f32 = simclr_reference(x, params)

    assert out.shape == (BATCH, INPUT_DIM)
    # Tight check against a reference with matching (bf16-MXU / f32-elementwise) precision.
    assert jnp.allclose(out, ref_bf16, atol=2e-3, rtol=2e-3), "mismatch vs bf16-precision reference"
    # Sanity check against the full-f32 PyTorch-equivalent reference (bf16 matmul error only).
    assert jnp.allclose(out, ref_f32, atol=3e-2, rtol=3e-2), "mismatch vs f32 reference"
    print("KERNEL_OK")
</pallas_src>

<mosaic_0001>
module attributes {stable_mosaic.version = 11 : i64} {
  func.func @_projection_head_kernel(%arg0: i32, %arg1: memref<8x256xf32, #tpu.memory_space<vmem>>, %arg2: memref<256x256xbf16, #tpu.memory_space<vmem>>, %arg3: memref<256x256xbf16, #tpu.memory_space<vmem>>, %arg4: memref<256x256xbf16, #tpu.memory_space<vmem>>, %arg5: memref<8x256xf32, #tpu.memory_space<vmem>>, %arg6: memref<8x256xf32, #tpu.memory_space<vmem>>) attributes {dimension_semantics = [#tpu.dimension_semantics<parallel>], iteration_bounds = array<i64: 2>, scalar_prefetch = 0 : i64, scratch_operands = 0 : i64, tpu.core_type = #tpu.core_type<tc>, window_params = [{transform_indices = @transform_0, window_bounds = array<i64: 8, 256>}, {pipeline_mode = #tpu.pipeline_mode<synchronous>, transform_indices = @transform_1, window_bounds = array<i64: 256, 256>}, {pipeline_mode = #tpu.pipeline_mode<synchronous>, transform_indices = @transform_2, window_bounds = array<i64: 256, 256>}, {pipeline_mode = #tpu.pipeline_mode<synchronous>, transform_indices = @transform_3, window_bounds = array<i64: 256, 256>}, {pipeline_mode = #tpu.pipeline_mode<synchronous>, transform_indices = @transform_4, window_bounds = array<i64: 8, 256>}, {transform_indices = @transform_5, window_bounds = array<i64: 8, 256>}]} {
    %c0 = arith.constant 0 : index
    %c0_0 = arith.constant 0 : index
    %0 = vector.load %arg1[%c0, %c0_0] : memref<8x256xf32, #tpu.memory_space<vmem>>, vector<8x256xf32>
    %c0_1 = arith.constant 0 : index
    %c0_2 = arith.constant 0 : index
    %1 = vector.load %arg5[%c0_1, %c0_2] : memref<8x256xf32, #tpu.memory_space<vmem>>, vector<8x256xf32>
    %2 = vector.extract_strided_slice %1 {offsets = [0, 0], sizes = [1, 256], strides = [1, 1]} : vector<8x256xf32> to vector<1x256xf32>
    %3 = vector.extract_strided_slice %1 {offsets = [1, 0], sizes = [1, 256], strides = [1, 1]} : vector<8x256xf32> to vector<1x256xf32>
    %4 = vector.extract_strided_slice %1 {offsets = [2, 0], sizes = [1, 256], strides = [1, 1]} : vector<8x256xf32> to vector<1x256xf32>
    %5 = arith.truncf %0 : vector<8x256xf32> to vector<8x256xbf16>
    %c0_3 = arith.constant 0 : index
    %c0_4 = arith.constant 0 : index
    %6 = vector.load %arg2[%c0_3, %c0_4] : memref<256x256xbf16, #tpu.memory_space<vmem>>, vector<256x256xbf16>
    %cst = arith.constant dense<0.000000e+00> : vector<8x256xf32>
    %7 = tpu.matmul %5, %6, %cst {dimension_numbers = #tpu.dot_dimension_numbers<[1], [0], [0], [1], [0, 0, 1, 1], [], []>} : vector<8x256xbf16>, vector<256x256xbf16>, vector<8x256xf32> -> vector<8x256xf32>
    %8 = vector.broadcast %2 : vector<1x256xf32> to vector<8x256xf32>
    %9 = arith.addf %7, %8 : vector<8x256xf32>
    %10 = arith.truncf %9 : vector<8x256xf32> to vector<8x256xbf16>
    %c0_5 = arith.constant 0 : index
    %c0_6 = arith.constant 0 : index
    %11 = vector.load %arg3[%c0_5, %c0_6] : memref<256x256xbf16, #tpu.memory_space<vmem>>, vector<256x256xbf16>
    %cst_7 = arith.constant dense<0.000000e+00> : vector<8x256xf32>
    %12 = tpu.matmul %10, %11, %cst_7 {dimension_numbers = #tpu.dot_dimension_numbers<[1], [0], [0], [1], [0, 0, 1, 1], [], []>} : vector<8x256xbf16>, vector<256x256xbf16>, vector<8x256xf32> -> vector<8x256xf32>
    %13 = vector.broadcast %3 : vector<1x256xf32> to vector<8x256xf32>
    %14 = arith.addf %12, %13 : vector<8x256xf32>
    %cst_8 = arith.constant 5.000000e-01 : f32
    %15 = vector.broadcast %cst_8 : f32 to vector<8x256xf32>
    %16 = arith.mulf %15, %14 : vector<8x256xf32>
    %17 = math.tanh %16 : vector<8x256xf32>
    %cst_9 = arith.constant 5.000000e-01 : f32
    %18 = vector.broadcast %cst_9 : f32 to vector<8x256xf32>
    %19 = arith.mulf %18, %17 : vector<8x256xf32>
    %cst_10 = arith.constant 5.000000e-01 : f32
    %20 = vector.broadcast %cst_10 : f32 to vector<8x256xf32>
    %21 = arith.addf %19, %20 : vector<8x256xf32>
    %22 = arith.mulf %14, %21 : vector<8x256xf32>
    %23 = arith.mulf %22, %9 : vector<8x256xf32>
    %24 = arith.truncf %23 : vector<8x256xf32> to vector<8x256xbf16>
    %c0_11 = arith.constant 0 : index
    %c0_12 = arith.constant 0 : index
    %25 = vector.load %arg4[%c0_11, %c0_12] : memref<256x256xbf16, #tpu.memory_space<vmem>>, vector<256x256xbf16>
    %cst_13 = arith.constant dense<0.000000e+00> : vector<8x256xf32>
    %26 = tpu.matmul %24, %25, %cst_13 {dimension_numbers = #tpu.dot_dimension_numbers<[1], [0], [0], [1], [0, 0, 1, 1], [], []>} : vector<8x256xbf16>, vector<256x256xbf16>, vector<8x256xf32> -> vector<8x256xf32>
    %27 = vector.broadcast %4 : vector<1x256xf32> to vector<8x256xf32>
    %28 = arith.addf %26, %27 : vector<8x256xf32>
    %c0_14 = arith.constant 0 : index
    %c0_15 = arith.constant 0 : index
    %29 = vector.load %arg6[%c0_14, %c0_15] : memref<8x256xf32, #tpu.memory_space<vmem>>, vector<8x256xf32>
    tpu.vector_store %arg6[%c0_14, %c0_15], %28 {strides = array<i32>} : memref<8x256xf32, #tpu.memory_space<vmem>>, vector<8x256xf32>,
    return
  }
  func.func @transform_0(%arg0: i32) -> (i32, i32) {
    %c0_i32 = arith.constant 0 : i32
    %c0_i32_0 = arith.constant 0 : i32
    return %arg0, %c0_i32 : i32, i32
  }
  func.func @transform_1(%arg0: i32) -> (i32, i32) {
    %c0_i32 = arith.constant 0 : i32
    %c0_i32_0 = arith.constant 0 : i32
    %c0_i32_1 = arith.constant 0 : i32
    return %c0_i32, %c0_i32_0 : i32, i32
  }
  func.func @transform_2(%arg0: i32) -> (i32, i32) {
    %c0_i32 = arith.constant 0 : i32
    %c0_i32_0 = arith.constant 0 : i32
    %c0_i32_1 = arith.constant 0 : i32
    return %c0_i32, %c0_i32_0 : i32, i32
  }
  func.func @transform_3(%arg0: i32) -> (i32, i32) {
    %c0_i32 = arith.constant 0 : i32
    %c0_i32_0 = arith.constant 0 : i32
    %c0_i32_1 = arith.constant 0 : i32
    return %c0_i32, %c0_i32_0 : i32, i32
  }
  func.func @transform_4(%arg0: i32) -> (i32, i32) {
    %c0_i32 = arith.constant 0 : i32
    %c0_i32_0 = arith.constant 0 : i32
    %c0_i32_1 = arith.constant 0 : i32
    return %c0_i32, %c0_i32_0 : i32, i32
  }
  func.func @transform_5(%arg0: i32) -> (i32, i32) {
    %c0_i32 = arith.constant 0 : i32
    %c0_i32_0 = arith.constant 0 : i32
    return %arg0, %c0_i32 : i32, i32
  }
}

module attributes {stable_mosaic.version = 11 : i64} {
  func.func @_projection_head_kernel(%arg0: i32, %arg1: memref<8x256xf32, #tpu.memory_space<vmem>>, %arg2: memref<256x256xbf16, #tpu.memory_space<vmem>>, %arg3: memref<256x256xbf16, #tpu.memory_space<vmem>>, %arg4: memref<256x256xbf16, #tpu.memory_space<vmem>>, %arg5: memref<8x256xf32, #tpu.memory_space<vmem>>, %arg6: memref<8x256xf32, #tpu.memory_space<vmem>>) attributes {dimension_semantics = [#tpu.dimension_semantics<parallel>], iteration_bounds = array<i64: 2>, scalar_prefetch = 0 : i64, scratch_operands = 0 : i64, tpu.core_type = #tpu.core_type<tc>, window_params = [{transform_indices = @transform_0, window_bounds = array<i64: 8, 256>}, {pipeline_mode = #tpu.pipeline_mode<synchronous>, transform_indices = @transform_1, window_bounds = array<i64: 256, 256>}, {pipeline_mode = #tpu.pipeline_mode<synchronous>, transform_indices = @transform_2, window_bounds = array<i64: 256, 256>}, {pipeline_mode = #tpu.pipeline_mode<synchronous>, transform_indices = @transform_3, window_bounds = array<i64: 256, 256>}, {pipeline_mode = #tpu.pipeline_mode<synchronous>, transform_indices = @transform_4, window_bounds = array<i64: 8, 256>}, {transform_indices = @transform_5, window_bounds = array<i64: 8, 256>}]} {
    %c0 = arith.constant 0 : index
    %c0_0 = arith.constant 0 : index
    %0 = vector.load %arg1[%c0, %c0_0] : memref<8x256xf32, #tpu.memory_space<vmem>>, vector<8x256xf32>
    %c0_1 = arith.constant 0 : index
    %c0_2 = arith.constant 0 : index
    %1 = vector.load %arg5[%c0_1, %c0_2] : memref<8x256xf32, #tpu.memory_space<vmem>>, vector<8x256xf32>
    %2 = vector.extract_strided_slice %1 {offsets = [0, 0], sizes = [1, 256], strides = [1, 1]} : vector<8x256xf32> to vector<1x256xf32>
    %3 = vector.extract_strided_slice %1 {offsets = [1, 0], sizes = [1, 256], strides = [1, 1]} : vector<8x256xf32> to vector<1x256xf32>
    %4 = vector.extract_strided_slice %1 {offsets = [2, 0], sizes = [1, 256], strides = [1, 1]} : vector<8x256xf32> to vector<1x256xf32>
    %5 = arith.truncf %0 : vector<8x256xf32> to vector<8x256xbf16>
    %c0_3 = arith.constant 0 : index
    %c0_4 = arith.constant 0 : index
    %6 = vector.load %arg2[%c0_3, %c0_4] : memref<256x256xbf16, #tpu.memory_space<vmem>>, vector<256x256xbf16>
    %cst = arith.constant dense<0.000000e+00> : vector<8x256xf32>
    %7 = tpu.matmul %5, %6, %cst {dimension_numbers = #tpu.dot_dimension_numbers<[1], [0], [0], [1], [0, 0, 1, 1], [], []>} : vector<8x256xbf16>, vector<256x256xbf16>, vector<8x256xf32> -> vector<8x256xf32>
    %8 = vector.broadcast %2 : vector<1x256xf32> to vector<8x256xf32>
    %9 = arith.addf %7, %8 : vector<8x256xf32>
    %10 = arith.truncf %9 : vector<8x256xf32> to vector<8x256xbf16>
    %c0_5 = arith.constant 0 : index
    %c0_6 = arith.constant 0 : index
    %11 = vector.load %arg3[%c0_5, %c0_6] : memref<256x256xbf16, #tpu.memory_space<vmem>>, vector<256x256xbf16>
    %cst_7 = arith.constant dense<0.000000e+00> : vector<8x256xf32>
    %12 = tpu.matmul %10, %11, %cst_7 {dimension_numbers = #tpu.dot_dimension_numbers<[1], [0], [0], [1], [0, 0, 1, 1], [], []>} : vector<8x256xbf16>, vector<256x256xbf16>, vector<8x256xf32> -> vector<8x256xf32>
    %13 = vector.broadcast %3 : vector<1x256xf32> to vector<8x256xf32>
    %14 = arith.addf %12, %13 : vector<8x256xf32>
    %cst_8 = arith.constant 5.000000e-01 : f32
    %15 = vector.broadcast %cst_8 : f32 to vector<8x256xf32>
    %16 = arith.mulf %15, %14 : vector<8x256xf32>
    %17 = math.tanh %16 : vector<8x256xf32>
    %cst_9 = arith.constant 5.000000e-01 : f32
    %18 = vector.broadcast %cst_9 : f32 to vector<8x256xf32>
    %19 = arith.mulf %18, %17 : vector<8x256xf32>
    %cst_10 = arith.constant 5.000000e-01 : f32
    %20 = vector.broadcast %cst_10 : f32 to vector<8x256xf32>
    %21 = arith.addf %19, %20 : vector<8x256xf32>
    %22 = arith.mulf %14, %21 : vector<8x256xf32>
    %23 = arith.mulf %22, %9 : vector<8x256xf32>
    %24 = arith.truncf %23 : vector<8x256xf32> to vector<8x256xbf16>
    %c0_11 = arith.constant 0 : index
    %c0_12 = arith.constant 0 : index
    %25 = vector.load %arg4[%c0_11, %c0_12] : memref<256x256xbf16, #tpu.memory_space<vmem>>, vector<256x256xbf16>
    %cst_13 = arith.constant dense<0.000000e+00> : vector<8x256xf32>
    %26 = tpu.matmul %24, %25, %cst_13 {dimension_numbers = #tpu.dot_dimension_numbers<[1], [0], [0], [1], [0, 0, 1, 1], [], []>} : vector<8x256xbf16>, vector<256x256xbf16>, vector<8x256xf32> -> vector<8x256xf32>
    %27 = vector.broadcast %4 : vector<1x256xf32> to vector<8x256xf32>
    %28 = arith.addf %26, %27 : vector<8x256xf32>
    %c0_14 = arith.constant 0 : index
    %c0_15 = arith.constant 0 : index
    %29 = vector.load %arg6[%c0_14, %c0_15] : memref<8x256xf32, #tpu.memory_space<vmem>>, vector<8x256xf32>
    tpu.vector_store %arg6[%c0_14, %c0_15], %28 {strides = array<i32>} : memref<8x256xf32, #tpu.memory_space<vmem>>, vector<8x256xf32>,
    return
  }
  func.func @transform_0(%arg0: i32) -> (i32, i32) {
    %c0_i32 = arith.constant 0 : i32
    %c0_i32_0 = arith.constant 0 : i32
    return %arg0, %c0_i32 : i32, i32
  }
  func.func @transform_1(%arg0: i32) -> (i32, i32) {
    %c0_i32 = arith.constant 0 : i32
    %c0_i32_0 = arith.constant 0 : i32
    %c0_i32_1 = arith.constant 0 : i32
    return %c0_i32, %c0_i32_0 : i32, i32
  }
  func.func @transform_2(%arg0: i32) -> (i32, i32) {
    %c0_i32 = arith.constant 0 : i32
    %c0_i32_0 = arith.constant 0 : i32
    %c0_i32_1 = arith.constant 0 : i32
    return %c0_i32, %c0_i32_0 : i32, i32
  }
  func.func @transform_3(%arg0: i32) -> (i32, i32) {
    %c0_i32 = arith.constant 0 : i32
    %c0_i32_0 = arith.constant 0 : i32
    %c0_i32_1 = arith.constant 0 : i32
    return %c0_i32, %c0_i32_0 : i32, i32
  }
  func.func @transform_4(%arg0: i32) -> (i32, i32) {
    %c0_i32 = arith.constant 0 : i32
    %c0_i32_0 = arith.constant 0 : i32
    %c0_i32_1 = arith.constant 0 : i32
    return %c0_i32, %c0_i32_0 : i32, i32
  }
  func.func @transform_5(%arg0: i32) -> (i32, i32) {
    %c0_i32 = arith.constant 0 : i32
    %c0_i32_0 = arith.constant 0 : i32
    return %arg0, %c0_i32 : i32, i32
  }
}

</mosaic_0001>

<bundles_post_ra>
// kernel: tpu_custom_call.1
= control target key start
LH: loop header
LB: loop body
LE: loop exit
PB: predicated region body
PF: predicated region fallthrough
CT: control target
= control target key end

     0   :  { %10 = vsyncpa [#allocation3], 0  ;;  %s2006_s0 = inlined_call_operand.hbm [shape: f32[16,256], index: 0, kind: input, shape index: {}]   ;;  %s2007_s1 = inlined_call_operand.hbm [shape: bf16[256,256], index: 1, kind: input, shape index: {}]   ;;  %s2008_s2 = inlined_call_operand.hbm [shape: bf16[256,256], index: 2, kind: input, shape index: {}]   ;;  %s2009_s3 = inlined_call_operand.hbm [shape: bf16[256,256], index: 3, kind: input, shape index: {}]   ;;  %s2010_s4 = inlined_call_operand.hbm [shape: f32[8,256], index: 4, kind: input, shape index: {}]   ;;  %s2011_s5 = inlined_call_operand.hbm [shape: f32[16,256], index: 5, kind: output, shape index: {}]  }
   0x1   :  { %12 = vsyncpa [#allocation3 + $0x1], 0 }
   0x2   :  { %13 = vsyncpa [#allocation6], 0 }
   0x3   :  { %14 = vsyncpa [#allocation9], 0 }
   0x4   :  { %15 = vsyncpa [#allocation4], 0 }
   0x5   :  { %17 = vsyncpa [#allocation4 + $0x1], 0  ;;  %s1768_s18 = smov 0   ;;  %s1770_s19 = smov 0  }
   0x6   :  { %s1772_s20 = smov 0   ;;  %s1774_s21 = smov 0  }
   0x7 LB: > { %s1730_s22 = smov [#allocation5]   ;;  %s1789_s24 = sadd.s32 4294967295, %s1728_s21   ;;  %s1728_s21 = sphi %s1774_s21, %s2035_s21   ;;  %s1724_s20 = sphi %s1772_s20, %s2034_s20   ;;  %s1720_s19 = sphi %s1770_s19, %s2033_s19   ;;  %s1716_s18 = sphi %s1768_s18, %s2032_s18  }
   0x8   : > { %s176_s23 = sshll.u32 %s1730_s22, 4  ;;  %p1168_p0 = scmp.ge.s32.totalorder %s1728_s21, 1  ;;  %s177_s23 = int_to_ptr.vmem [resolvable:$true] %s176_s23 }
   0x9   : > { %p2012_p1 = scmp.eq.s32.totalorder %s1789_s24, 0  ;;  %p164_p2 = scmp.lt.s32.totalorder %s1728_s21, 3 }
   0xa   : > { %s1731_s26 = smov [#allocation8]   ;;  %s1732_s29 = smov [#allocation7]  }
   0xb   : > { %p1794_p3 = pnand %p1168_p0, %p164_p2  ;;  %s202_s27 = sshll.u32 %s1731_s26, 4  ;;  %s1807_s27 = int_to_ptr.vmem [resolvable:$true] %s202_s27 }
   0xc   : > { %s189_s30 = sshll.u32 %s1732_s29, 4  ;;  %s1535_s6 = scalar_lea.vmem %s177_s23, 4096  ;;  %s1809_s30 = int_to_ptr.vmem [resolvable:$true] %s189_s30 }
   0xd   : > { %s2016_s25 = scalar_select %p1794_p3, 1, 0 }
   0xe   : > { %p1307_p5 = pneg %p1794_p3  ;;  %p1536_p8 = scmp.ne.s32.totalorder %s177_s23, %s1535_s6 }
   0xf   : > { %p1543_p11 = scmp.lt.s32.totalorder %s177_s23, %s177_s23  ;;  %p1544_p12 = scmp.lt.s32.totalorder %s1535_s6, %s1535_s6 }
  0x10   : > { %p1803_p6 = pnand %p1307_p5, %p2012_p1 }
  0x11   : > { %p1545_p13 = por %p1544_p12, %p1543_p11 }
  0x12   : > { %p1526_p7 = pneg %p1803_p6 }
  0x14   : > { %p1538_p9 = pnand %p1536_p8, %p1526_p7 }
  0x16   : > { %p1539_p10 = pneg %p1538_p9 }
  0x18   : > { %p1546_p0 = pnand %p1545_p13, %p1539_p10 }
  0x1a   : > { %1549 = shalt.err (!%p1546_p0)
}
  0x1b   : > { %s1733_s7 = smov 128   ;;  %s1734_s8 = smov 8  }
  0x1c   : > { %1310 = dma.hbm_to_vmem [thread:$0]  (!%p1803_p6), %s2007_s1, 4096, %s177_s23, [#allocation6], %s1733_s7, %s1733_s7, %s1734_s8  }
  0x1d   : > { %s1561_s11 = scalar_lea.vmem %s1807_s27, 4096  ;;  %p1569_p9 = scmp.lt.s32.totalorder %s1807_s27, %s1807_s27 }
  0x1e   : > { %p1562_p2 = scmp.ne.s32.totalorder %s1807_s27, %s1561_s11  ;;  %p1570_p10 = scmp.lt.s32.totalorder %s1561_s11, %s1561_s11 }
  0x20   : > { %p1564_p5 = pnand %p1562_p2, %p1526_p7  ;;  %p1571_p11 = por %p1570_p10, %p1569_p9 }
  0x22   : > { %p1565_p8 = pneg %p1564_p5 }
  0x24   : > { %p1572_p12 = pnand %p1571_p11, %p1565_p8 }
  0x26   : > { %1575 = shalt.err (!%p1572_p12)
}
  0x27   : > { %1316 = dma.hbm_to_vmem [thread:$0]  (!%p1803_p6), %s2009_s3, 4096, %s1807_s27, [#allocation9], %s1733_s7, %s1733_s7, %s1734_s8  }
  0x28   : > { %s1587_s14 = scalar_lea.vmem %s1809_s30, 4096  ;;  %p1595_p5 = scmp.lt.s32.totalorder %s1809_s30, %s1809_s30 }
  0x29   : > { %p1588_p13 = scmp.ne.s32.totalorder %s1809_s30, %s1587_s14  ;;  %p1596_p8 = scmp.lt.s32.totalorder %s1587_s14, %s1587_s14 }
  0x2b   : > { %p1590_p0 = pnand %p1588_p13, %p1526_p7  ;;  %p1597_p9 = por %p1596_p8, %p1595_p5 }
  0x2d   : > { %p1591_p2 = pneg %p1590_p0 }
  0x2f   : > { %p1598_p10 = pnand %p1597_p9, %p1591_p2 }
  0x31   : > { %1601 = shalt.err (!%p1598_p10)
}
  0x32   : > { %1313 = dma.hbm_to_vmem [thread:$0]  (!%p1803_p6), %s2008_s2, 4096, %s1809_s30, [#allocation6], %s1733_s7, %s1733_s7, %s1734_s8  }
  0x33   : > { %s1735_s17 = smov [#allocation10]  }
  0x34   : > { %s216_s22 = sshll.u32 %s1735_s17, 4  ;;  %s217_s22 = int_to_ptr.vmem [resolvable:$true] %s216_s22 }
  0x35   : > { %s1613_s23 = scalar_lea.vmem %s217_s22, 256  ;;  %p1621_p0 = scmp.lt.s32.totalorder %s217_s22, %s217_s22 }
  0x36   : > { %p1614_p11 = scmp.ne.s32.totalorder %s217_s22, %s1613_s23  ;;  %p1622_p2 = scmp.lt.s32.totalorder %s1613_s23, %s1613_s23 }
  0x38   : > { %p1616_p12 = pnand %p1614_p11, %p1526_p7  ;;  %p1623_p5 = por %p1622_p2, %p1621_p0 }
  0x3a   : > { %p1617_p13 = pneg %p1616_p12 }
  0x3c   : > { %p1624_p8 = pnand %p1623_p5, %p1617_p13 }
  0x3e   : > { %1627 = shalt.err (!%p1624_p8)
}
  0x3f   : > { %1319 = dma.hbm_to_vmem [thread:$0]  (!%p1803_p6), %s2010_s4, 256, %s217_s22, [#allocation9]  }
  0x40   : > { %s1167_s29 = sadd.s32 4294967294, %s1728_s21   ;;  %s1857_s28 = sadd.s32 1, %s1728_s21  }
  0x41   : > { %s27_s30 = ssub.s32 %s1728_s21, %s1857_s28  ;;  %s30_s6 = sadd.s32 1, %s1724_s20 }
  0x42   : > { %p28_p7 = scmp.eq.s32.totalorder %s27_s30, 0  ;;  %p37_p9 = scmp.ne.s32.totalorder %s1724_s20, %s1720_s19 }
  0x43   : > { %p38_p10 = scmp.eq.s32.totalorder %s1728_s21, 0  ;;  %p43_p11 = scmp.ne.s32.totalorder %s1720_s19, %s1716_s18 }
  0x44   : > { %s1868_s7 = scalar_select %p28_p7, %s1724_s20, %s30_s6  }
  0x45   : > { %p1870_p12 = por %p38_p10, %p37_p9  ;;  %p1876_p6 = por %p2012_p1, %p43_p11 }
  0x46   : > { %p151_p13 = scmp.eq.s32.totalorder %s1789_s24, 1  ;;  %p157_p0 = scmp.eq.s32.totalorder %s1167_s29, 1 }
  0x47   : > { %s2019_s9 = scalar_select %p1876_p6, 1, 0 }
  0x48   : > { %p1332_p2 = scmp.lt.s32.totalorder %s1728_s21, 2  ;;  %s227_s10 = sand.u32 1, %s1724_s20  }
  0x49   : > { %p1883_p5 = por %p151_p13, %p37_p9  ;;  %p1887_p8 = por %p157_p0, %p43_p11 }
  0x4a   : > { %s1174_s13 = sshll.u32 %s227_s10, 4  ;;  %s1285_s14 = sshll.u32 %s1728_s21, 8 }
  0x4b   : > { %s2020_s11 = scalar_select %p1883_p5, 1, 0 }
  0x4c   : > { %s2021_s12 = scalar_select %p1887_p8, 1, 0 }
  0x4d   : > { %s1895_s17 = scalar_lea.hbm %s2006_s0, %s1285_s14  ;;  %s231_s22 = scalar_lea.vmem [#allocation2], %s1174_s13 }
  0x4e   : > { %s239_s23 = sshll.u32 %s231_s22, 4  ;;  %p1899_p7 = pnand %p1332_p2, %p1870_p12  ;;  %s240_s23 = int_to_ptr.vmem [resolvable:$true] %s239_s23 }
  0x4f   : > { %s228_s27 = scalar_lea.sflag [#allocation3], %s227_s10  ;;  %s1628_s29 = scalar_lea.hbm %s1895_s17, 256 }
  0x50   : > { %p1629_p9 = scmp.ne.s32.totalorder %s1895_s17, %s1628_s29  ;;  %p1630_p10 = pneg %p1899_p7 }
  0x51   : > { %s1633_s14 = scalar_lea.hbm %s2006_s0, 512  ;;  %p1634_p0 = scmp.lt.s32.totalorder %s1895_s17, %s2006_s0 }
  0x52   : > { %p1631_p11 = pnand %p1630_p10, %p1629_p9  ;;  %p1635_p12 = scmp.lt.s32.totalorder %s1633_s14, %s1628_s29 }
  0x54   : > { %p1632_p13 = pneg %p1631_p11  ;;  %p1636_p2 = por %p1635_p12, %p1634_p0 }
  0x56   : > { %p1637_p4 = pnand %p1636_p2, %p1632_p13 }
  0x58   : > { %1640 = shalt.err (!%p1637_p4)
}
  0x59   : > { %s1641_s8 = scalar_lea.vmem %s240_s23, 256  ;;  %s1736_s10 = smov [#allocation2]  }
  0x5a   : > { %p1642_p1 = scmp.ne.s32.totalorder %s240_s23, %s1641_s8  ;;  %s1646_s16 = sshll.u32 %s1736_s10, 4  ;;  %s1647_s16 = int_to_ptr.vmem [resolvable:$false] %s1646_s16 }
  0x5b   : > { %s1648_s22 = scalar_lea.vmem %s1647_s16, 512  ;;  %p1649_p9 = scmp.lt.s32.totalorder %s240_s23, %s1647_s16 }
  0x5c   : > { %p1644_p8 = pnand %p1642_p1, %p1630_p10  ;;  %p1650_p11 = scmp.lt.s32.totalorder %s1648_s22, %s1641_s8 }
  0x5e   : > { %p1645_p5 = pneg %p1644_p8  ;;  %p1651_p6 = por %p1650_p11, %p1649_p9 }
  0x60   : > { %p1652_p3 = pnand %p1651_p6, %p1645_p5 }
  0x62   : > { %1655 = shalt.err (!%p1652_p3)
}
  0x63   : > { %1323 = dma.hbm_to_vmem [thread:$0]  (!%p1899_p7), %s1895_s17, 256, %s240_s23, %s228_s27  }
  0x64   : > { %p2023_p13 = scmp.ne.s32.totalorder %s2016_s25, 0 }
  0x65   : > { %s1920_s29 = sand.u32 (!%p2023_p13), 1, %s1720_s19   ;;  %p2024_p1 = scmp.ne.s32.totalorder (!%p2023_p13), %s2019_s9, 0 }
  0x66   : > { %248 = sbr.rel (%p2023_p13) target bundleno = 814 (0x32e), region = 40  ;;  %s1178_s30 = sshll.u32 (!%p2023_p13), %s1920_s29, 4 }
  0x67   : > { %s251_s6 = scalar_lea.sflag (!%p2023_p13), [#allocation3], %s1920_s29  ;;  %s1926_s14 = scalar_lea.vmem (!%p2023_p13), [#allocation2], %s1178_s30 }
  0x6b   : > { %1699 = dma.done.wait (%p2024_p1), %s251_s6, 256  }
  0x6c   : > { %1701 = vsyncadd (%p2024_p1), %s251_s6, 4294967040  ;;  %p2025_p3 = scmp.eq.s32.totalorder %s1789_s24, 0 }
  0x6e   : > { %1703 = dma.done.wait (%p2025_p3), [#allocation6], 8192   ;;  %p2026_p4 = pmov %p2025_p3 }
  0x6f   : > { %p2027_p6 = pmov %p2025_p3 }
  0x70   : > { %1705 = vsyncadd (%p2026_p4), [#allocation6], 4294959104 }
  0x71   : > { %1707 = dma.done.wait (%p2027_p6), [#allocation9], 4352   ;;  %p2028_p5 = pmov %p2025_p3 }
  0x72   : > { %v1376_v0 = vld [vmem:[#allocation5 + $0x74] ss:$8 sps:$4 sm:$0xff]   ;;  %v1378_v1 = vld [vmem:[#allocation5 + $0x70] ss:$8 sps:$4 sm:$0xff]   ;;  %v1379_v2 = vld [vmem:[#allocation5 + $0x64] ss:$8 sps:$4 sm:$0xff]  }
  0x73   : > { %1709 = vsyncadd (%p2028_p5), [#allocation9], 4294962944  ;;  %503 = vmatprep.subr.bf16.mxu0 %v1376_v0  ;;  %v1381_v3 = vld [vmem:[#allocation5 + $0x60] ss:$8 sps:$4 sm:$0xff]   ;;  %v1382_v4 = vld [vmem:[#allocation5 + $0x54] ss:$8 sps:$4 sm:$0xff]  }
  0x74   : > { %504 = vmatpush1.bf16.msra.mxu0 %v1378_v1  ;;  %v1384_v5 = vld [vmem:[#allocation5 + $0x50] ss:$8 sps:$4 sm:$0xff]   ;;  %v1385_v6 = vld [vmem:[#allocation5 + $0x44] ss:$8 sps:$4 sm:$0xff]   ;;  %v1387_v7 = vld [vmem:[#allocation5 + $0x40] ss:$8 sps:$4 sm:$0xff]  }
  0x75   : > { %505 = vmatprep.subr.bf16.mxu0 %v1379_v2  ;;  %v1388_v8 = vld [vmem:[#allocation5 + $0x34] ss:$8 sps:$4 sm:$0xff]   ;;  %v1390_v9 = vld [vmem:[#allocation5 + $0x30] ss:$8 sps:$4 sm:$0xff]   ;;  %v1391_v10 = vld [vmem:[#allocation5 + $0x24] ss:$8 sps:$4 sm:$0xff]  }
  0x76   : > { %v1393_v11 = vld [vmem:[#allocation5 + $0x20] ss:$8 sps:$4 sm:$0xff]   ;;  %v1394_v12 = vld [vmem:[#allocation5 + $0x14] ss:$8 sps:$4 sm:$0xff]   ;;  %v1396_v13 = vld [vmem:[#allocation5 + $0x10] ss:$8 sps:$4 sm:$0xff]  }
  0x77   : > { %v298_v14 = vld [vmem:[%s1926_s14 + $0x8] sm:$0xff]  ;;  %v297_v54 = vld [vmem:[%s1926_s14] sm:$0xff]  ;;  %s1286_s25 = sshll.u32 %s1789_s24, 8  ;;  %s296_s9 = scalar_lea.vmem [#allocation11], %s1178_s30 }
  0x78   : > { %506 = vmatpush1.bf16.msra.mxu0 %v1381_v3  ;;  %v302_v15 = vpack.c.bf16 %v298_v14, %v298_v14  ;;  %v1424_v16 = vld [vmem:[#allocation7 + $0x74] ss:$8 sps:$4 sm:$0xff]   ;;  %v1426_v17 = vld [vmem:[#allocation7 + $0x70] ss:$8 sps:$4 sm:$0xff]   ;;  %v1397_v18 = vld [vmem:[#allocation5 + $0x4] ss:$8 sps:$4 sm:$0xff]   ;;  %v301_v56 = vpack.c.bf16 %v297_v54, %v297_v54  ;;  %s1963_s27 = scalar_lea.hbm %s2011_s5, %s1286_s25 }
  0x79   : > { %507 = vmatprep.subr.bf16.mxu0 %v1382_v4  ;;  %v1427_v19 = vld [vmem:[#allocation7 + $0x64] ss:$8 sps:$4 sm:$0xff]   ;;  %v1399_v20 = vld [vmem:[#allocation5] ss:$8 sps:$4 sm:$0xff]   ;;  %746 = vmatprep.subr.bf16.mxu1 %v1424_v16  ;;  %v1430_v22 = vld [vmem:[#allocation7 + $0x54] ss:$8 sps:$4 sm:$0xff]  }
  0x7a   : > { %535 = vmatprep.mubr.bf16.mxu0 %v302_v15  ;;  %747 = vmatpush1.bf16.msra.mxu1 %v1426_v17  ;;  %v1429_v21 = vld [vmem:[#allocation7 + $0x60] ss:$8 sps:$4 sm:$0xff]   ;;  %v1400_v23 = vld [vmem:[#allocation5 + $0xf4] ss:$8 sps:$4 sm:$0xff]   ;;  %v1402_v24 = vld [vmem:[#allocation5 + $0xf0] ss:$8 sps:$4 sm:$0xff]  }
  0x7b   : > { %748 = vmatprep.subr.bf16.mxu1 %v1427_v19  ;;  %v1432_v25 = vld [vmem:[#allocation7 + $0x50] ss:$8 sps:$4 sm:$0xff]   ;;  %v1433_v26 = vld [vmem:[#allocation7 + $0x44] ss:$8 sps:$4 sm:$0xff]   ;;  %v1405_v28 = vld [vmem:[#allocation5 + $0xe0] ss:$8 sps:$4 sm:$0xff]  }
  0x7c   : > { %508 = vmatpush1.bf16.msra.mxu0 %v1384_v5  ;;  %v1403_v27 = vld [vmem:[#allocation5 + $0xe4] ss:$8 sps:$4 sm:$0xff]   ;;  %v1435_v29 = vld [vmem:[#allocation7 + $0x40] ss:$8 sps:$4 sm:$0xff]   ;;  %v1436_v30 = vld [vmem:[#allocation7 + $0x34] ss:$8 sps:$4 sm:$0xff]  }
  0x7d   : > { %509 = vmatprep.subr.bf16.mxu0 %v1385_v6  ;;  %v1406_v31 = vld [vmem:[#allocation5 + $0xd4] ss:$8 sps:$4 sm:$0xff]   ;;  %v1408_v32 = vld [vmem:[#allocation5 + $0xd0] ss:$8 sps:$4 sm:$0xff]   ;;  %v1439_v34 = vld [vmem:[#allocation7 + $0x24] ss:$8 sps:$4 sm:$0xff]  }
  0x7e   : > { %749 = vmatpush1.bf16.msra.mxu1 %v1429_v21  ;;  %v1438_v33 = vld [vmem:[#allocation7 + $0x30] ss:$8 sps:$4 sm:$0xff]   ;;  %v1409_v35 = vld [vmem:[#allocation5 + $0xc4] ss:$8 sps:$4 sm:$0xff]   ;;  %v1441_v36 = vld [vmem:[#allocation7 + $0x20] ss:$8 sps:$4 sm:$0xff]  }
  0x7f   : > { %750 = vmatprep.subr.bf16.mxu1 %v1430_v22  ;;  %v1411_v37 = vld [vmem:[#allocation5 + $0xc0] ss:$8 sps:$4 sm:$0xff]   ;;  %v1442_v38 = vld [vmem:[#allocation7 + $0x14] ss:$8 sps:$4 sm:$0xff]   ;;  %v1444_v40 = vld [vmem:[#allocation7 + $0x10] ss:$8 sps:$4 sm:$0xff]  }
  0x80   : > { %510 = vmatpush1.bf16.msra.mxu0 %v1387_v7  ;;  %v1412_v39 = vld [vmem:[#allocation5 + $0xb4] ss:$8 sps:$4 sm:$0xff]   ;;  %v1414_v41 = vld [vmem:[#allocation5 + $0xb0] ss:$8 sps:$4 sm:$0xff]   ;;  %v1445_v42 = vld [vmem:[#allocation7 + $0x4] ss:$8 sps:$4 sm:$0xff]  }
  0x81   : > { %511 = vmatprep.subr.bf16.mxu0 %v1388_v8  ;;  %v1415_v43 = vld [vmem:[#allocation5 + $0xa4] ss:$8 sps:$4 sm:$0xff]   ;;  %v1447_v44 = vld [vmem:[#allocation7] ss:$8 sps:$4 sm:$0xff]   ;;  %v1448_v46 = vld [vmem:[#allocation7 + $0xf4] ss:$8 sps:$4 sm:$0xff]  }
  0x82   : > { %751 = vmatpush1.bf16.msra.mxu1 %v1432_v25  ;;  %v1417_v45 = vld [vmem:[#allocation5 + $0xa0] ss:$8 sps:$4 sm:$0xff]   ;;  %v1418_v47 = vld [vmem:[#allocation5 + $0x94] ss:$8 sps:$4 sm:$0xff]   ;;  %v1450_v48 = vld [vmem:[#allocation7 + $0xf0] ss:$8 sps:$4 sm:$0xff]  }
  0x83   : > { %752 = vmatprep.subr.bf16.mxu1 %v1433_v26  ;;  %v1420_v49 = vld [vmem:[#allocation5 + $0x90] ss:$8 sps:$4 sm:$0xff]   ;;  %v1451_v50 = vld [vmem:[#allocation7 + $0xe4] ss:$8 sps:$4 sm:$0xff]   ;;  %v1453_v52 = vld [vmem:[#allocation7 + $0xe0] ss:$8 sps:$4 sm:$0xff]  }
  0x84   : > { %512 = vmatpush1.bf16.msra.mxu0 %v1390_v9  ;;  %v1421_v51 = vld [vmem:[#allocation5 + $0x84] ss:$8 sps:$4 sm:$0xff]   ;;  %v1423_v53 = vld [vmem:[#allocation5 + $0x80] ss:$8 sps:$4 sm:$0xff]   ;;  %v1454_v55 = vld [vmem:[#allocation7 + $0xd4] ss:$8 sps:$4 sm:$0xff]  }
  0x85   : > { %513 = vmatprep.subr.bf16.mxu0 %v1391_v10  ;;  %v1456_v57 = vld [vmem:[#allocation7 + $0xd0] ss:$8 sps:$4 sm:$0xff]   ;;  %v1457_v58 = vld [vmem:[#allocation7 + $0xc4] ss:$8 sps:$4 sm:$0xff]   ;;  %v1459_v59 = vld [vmem:[#allocation7 + $0xc0] ss:$8 sps:$4 sm:$0xff]  }
  0x86   : > { %753 = vmatpush1.bf16.msra.mxu1 %v1435_v29  ;;  %v1460_v60 = vld [vmem:[#allocation7 + $0xb4] ss:$8 sps:$4 sm:$0xff]   ;;  %v1462_v61 = vld [vmem:[#allocation7 + $0xb0] ss:$8 sps:$4 sm:$0xff]   ;;  %v1463_v62 = vld [vmem:[#allocation7 + $0xa4] ss:$8 sps:$4 sm:$0xff]  }
  0x87   : > { %754 = vmatprep.subr.bf16.mxu1 %v1436_v30  ;;  %v1465_v63 = vld [vmem:[#allocation7 + $0xa0] ss:$8 sps:$4 sm:$0xff]   ;;  %v1466_v0 = vld [vmem:[#allocation7 + $0x94] ss:$8 sps:$4 sm:$0xff]   ;;  %v1468_v1 = vld [vmem:[#allocation7 + $0x90] ss:$8 sps:$4 sm:$0xff]  }
  0x88   : > { %514 = vmatpush1.bf16.msra.mxu0 %v1393_v11  ;;  %v1469_v2 = vld [vmem:[#allocation7 + $0x84] ss:$8 sps:$4 sm:$0xff]   ;;  %v1471_v3 = vld [vmem:[#allocation7 + $0x80] ss:$8 sps:$4 sm:$0xff]   ;;  %v1472_v4 = vld [vmem:[#allocation8 + $0x70] ss:$8 sps:$4 sm:$0xff]  }
  0x89   : > { %515 = vmatprep.subr.bf16.mxu0 %v1394_v12  ;;  %v1474_v5 = vld [vmem:[#allocation8 + $0x74] ss:$8 sps:$4 sm:$0xff]   ;;  %v1477_v6 = vld [vmem:[#allocation8 + $0x64] ss:$8 sps:$4 sm:$0xff]   ;;  %v1475_v7 = vld [vmem:[#allocation8 + $0x60] ss:$8 sps:$4 sm:$0xff]  }
  0x8a   : > { %755 = vmatpush1.bf16.msra.mxu1 %v1438_v33  ;;  %v1480_v8 = vld [vmem:[#allocation8 + $0x54] ss:$8 sps:$4 sm:$0xff]   ;;  %v1478_v9 = vld [vmem:[#allocation8 + $0x50] ss:$8 sps:$4 sm:$0xff]   ;;  %v1483_v10 = vld [vmem:[#allocation8 + $0x44] ss:$8 sps:$4 sm:$0xff]  }
  0x8b   : > { %756 = vmatprep.subr.bf16.mxu1 %v1439_v34  ;;  %v1481_v11 = vld [vmem:[#allocation8 + $0x40] ss:$8 sps:$4 sm:$0xff]   ;;  %v1486_v12 = vld [vmem:[#allocation8 + $0x34] ss:$8 sps:$4 sm:$0xff]   ;;  %v1489_v14 = vld [vmem:[#allocation8 + $0x24] ss:$8 sps:$4 sm:$0xff]  }
  0x8c   : > { %516 = vmatpush1.bf16.msra.mxu0 %v1396_v13  ;;  %v1484_v13 = vld [vmem:[#allocation8 + $0x30] ss:$8 sps:$4 sm:$0xff]   ;;  %v1487_v15 = vld [vmem:[#allocation8 + $0x20] ss:$8 sps:$4 sm:$0xff]   ;;  %v1492_v16 = vld [vmem:[#allocation8 + $0x14] ss:$8 sps:$4 sm:$0xff]  }
  0x8d   : > { %517 = vmatprep.subr.bf16.mxu0 %v1397_v18  ;;  %v1490_v17 = vld [vmem:[#allocation8 + $0x10] ss:$8 sps:$4 sm:$0xff]   ;;  %v1495_v18 = vld [vmem:[#allocation8 + $0x4] ss:$8 sps:$4 sm:$0xff]   ;;  %v1493_v19 = vld [vmem:[#allocation8] ss:$8 sps:$4 sm:$0xff]  }
  0x8e   : > { %757 = vmatpush1.bf16.msra.mxu1 %v1441_v36  ;;  %v1496_v36 = vld [vmem:[#allocation8 + $0xf0] ss:$8 sps:$4 sm:$0xff]   ;;  %s1059_s17 = sshll.u32 %s296_s9, 4  ;;  %s1045_s24 = scalar_lea.sflag [#allocation4], %s1920_s29  ;;  %s1965_s17 = int_to_ptr.vmem [resolvable:$true] %s1059_s17 }
  0x8f   : > { %758 = vmatprep.subr.bf16.mxu1 %v1442_v38  ;;  %v1499_v38 = vld [vmem:[#allocation8 + $0xe0] ss:$8 sps:$4 sm:$0xff]   ;;  %s1656_s13 = scalar_lea.vmem %s1965_s17, 256  ;;  %p2029_p7 = scmp.ne.s32.totalorder %s2020_s11, 0 }
  0x90   : > { %518 = vmatpush1.bf16.msra.mxu0 %v1399_v20  ;;  %v335_v20 = vlaneseq  ;;  %p1657_p8 = scmp.ne.s32.totalorder %s1965_s17, %s1656_s13  ;;  %s1737_s15 = smov [#allocation11]  }
  0x91   : > { %519 = vmatprep.subr.bf16.mxu0 %v1400_v23  ;;  %v1945_v23 = vld [vmem:[#allocation10] sm:$0xff]  ;;  %s1660_s8 = sshll.u32 %s1737_s15, 4  ;;  %s1661_s8 = int_to_ptr.vmem [resolvable:$false] %s1660_s8 }
  0x92   : > { %759 = vmatpush1.bf16.msra.mxu1 %v1444_v40  ;;  %v1942_v21 = vshrl.u32 %v335_v20, 7  ;;  %v1502_v40 = vld [vmem:[#allocation8 + $0xd0] ss:$8 sps:$4 sm:$0xff]   ;;  %p1658_p10 = pnand %p1657_p8, %p2029_p7  ;;  %s1662_s10 = scalar_lea.vmem %s1661_s8, 512 }
  0x93   : > { %760 = vmatprep.subr.bf16.mxu1 %v1445_v42  ;;  %v1505_v42 = vld [vmem:[#allocation8 + $0xc0] ss:$8 sps:$4 sm:$0xff]   ;;  %p1663_p12 = scmp.lt.s32.totalorder %s1965_s17, %s1661_s8  ;;  %p1664_p2 = scmp.lt.s32.totalorder %s1662_s10, %s1656_s13 }
  0x94   : > { %520 = vmatpush2.bf16.msra.mxu0 %v1402_v24  ;;  %v337_v22 = vsub.s32 0, %v1942_v21  ;;  %v1947_v24 = vld [vmem:[#allocation10 + $0x8] sm:$0xff]  ;;  %p1659_p0 = pneg %p1658_p10 }
  0x95   : > { %521 = vmatprep.subr.bf16.mxu0 %v1403_v27  ;;  %p1665_p9 = por %p1664_p2, %p1663_p12 }
  0x96   : > { %761 = vmatpush1.bf16.msra.mxu1 %v1447_v44  ;;  %v338_v25 = vrot.slane %v1945_v23, %v337_v22  ;;  %v342_v26 = vrot.slane %v1947_v24, %v337_v22  ;;  %v1508_v44 = vld [vmem:[#allocation8 + $0xb0] ss:$8 sps:$4 sm:$0xff]  }
  0x97   : > { %762 = vmatprep.subr.bf16.mxu1 %v1448_v46  ;;  %v1511_v46 = vld [vmem:[#allocation8 + $0xa0] ss:$8 sps:$4 sm:$0xff]   ;;  %p1666_p11 = pnand %p1665_p9, %p1659_p0 }
  0x98   : > { %522 = vmatpush2.bf16.msra.mxu0 %v1405_v28 }
  0x99   : > { %523 = vmatprep.subr.bf16.mxu0 %v1406_v31 }
  0x9a   : > { %763 = vmatpush2.bf16.msra.mxu1 %v1450_v48  ;;  %v1514_v48 = vld [vmem:[#allocation8 + $0x90] ss:$8 sps:$4 sm:$0xff]  }
  0x9b   : > { %764 = vmatprep.subr.bf16.mxu1 %v1451_v50  ;;  %v1517_v50 = vld [vmem:[#allocation8 + $0x80] ss:$8 sps:$4 sm:$0xff]  }
  0x9c   : > { %524 = vmatpush2.bf16.msra.mxu0 %v1408_v32 }
  0x9d   : > { %525 = vmatprep.subr.bf16.mxu0 %v1409_v35  ;;  %v1498_v35 = vld [vmem:[#allocation8 + $0xf4] ss:$8 sps:$4 sm:$0xff]  }
  0x9e   : > { %765 = vmatpush2.bf16.msra.mxu1 %v1453_v52 }
  0x9f   : > { %766 = vmatprep.subr.bf16.mxu1 %v1454_v55 }
  0xa0   : > { %526 = vmatpush2.bf16.msra.mxu0 %v1411_v37  ;;  %v1501_v37 = vld [vmem:[#allocation8 + $0xe4] ss:$8 sps:$4 sm:$0xff]  }
  0xa1   : > { %527 = vmatprep.subr.bf16.mxu0 %v1412_v39  ;;  %v1504_v39 = vld [vmem:[#allocation8 + $0xd4] ss:$8 sps:$4 sm:$0xff]  }
  0xa2   : > { %767 = vmatpush2.bf16.msra.mxu1 %v1456_v57 }
  0xa3   : > { %768 = vmatprep.subr.bf16.mxu1 %v1457_v58 }
  0xa4   : > { %528 = vmatpush2.bf16.msra.mxu0 %v1414_v41  ;;  %v1507_v41 = vld [vmem:[#allocation8 + $0xc4] ss:$8 sps:$4 sm:$0xff]  }
  0xa5   : > { %529 = vmatprep.subr.bf16.mxu0 %v1415_v43  ;;  %v1510_v43 = vld [vmem:[#allocation8 + $0xb4] ss:$8 sps:$4 sm:$0xff]  }
  0xa6   : > { %769 = vmatpush2.bf16.msra.mxu1 %v1459_v59 }
  0xa7   : > { %770 = vmatprep.subr.bf16.mxu1 %v1460_v60 }
  0xa8   : > { %530 = vmatpush2.bf16.msra.mxu0 %v1417_v45  ;;  %v1513_v45 = vld [vmem:[#allocation8 + $0xa4] ss:$8 sps:$4 sm:$0xff]  }
  0xa9   : > { %531 = vmatprep.subr.bf16.mxu0 %v1418_v47  ;;  %v1516_v47 = vld [vmem:[#allocation8 + $0x94] ss:$8 sps:$4 sm:$0xff]  }
  0xaa   : > { %771 = vmatpush2.bf16.msra.mxu1 %v1462_v61 }
  0xab   : > { %772 = vmatprep.subr.bf16.mxu1 %v1463_v62 }
  0xac   : > { %532 = vmatpush2.bf16.msra.mxu0 %v1420_v49  ;;  %v1519_v49 = vld [vmem:[#allocation8 + $0x84] ss:$8 sps:$4 sm:$0xff]  }
  0xad   : > { %533 = vmatprep.subr.bf16.mxu0 %v1421_v51  ;;  %v580_v51 = vsub.s32 1, %v1942_v21 }
  0xae   : > { %773 = vmatpush2.bf16.msra.mxu1 %v1465_v63 }
  0xaf   : > { %774 = vmatprep.subr.bf16.mxu1 %v1466_v0  ;;  %v581_v52 = vrot.slane %v1945_v23, %v580_v51 }
  0xb0   : > { %534 = vmatpush2.bf16.msra.mxu0 %v1423_v53  ;;  %v585_v53 = vrot.slane %v1947_v24, %v580_v51 }
  0xb1   : > { %1001 = vmatprep.subr.bf16.mxu0 %v1474_v5 }
  0xb2   : > { %775 = vmatpush2.bf16.msra.mxu1 %v1468_v1 }
  0xb3   : > { %536 = vmatmul.mubr.bf16.vlgmr.msra.gmra.mxu0 %v301_v56  ;;  %776 = vmatprep.subr.bf16.mxu1 %v1469_v2 }
  0xb4   : > { %1002 = vmatpush1.bf16.msra.mxu0 %v1472_v4 }
  0xb5   : > { %1003 = vmatprep.subr.bf16.mxu0 %v1477_v6 }
  0xb6   : > { %777 = vmatpush2.bf16.msra.mxu1 %v1471_v3 }
  0xb8   : > { %1004 = vmatpush1.bf16.msra.mxu0 %v1475_v7 }
  0xb9   : > { %1005 = vmatprep.subr.bf16.mxu0 %v1480_v8 }
  0xbc   : > { %1006 = vmatpush1.bf16.msra.mxu0 %v1478_v9 }
  0xbd   : > { %1007 = vmatprep.subr.bf16.mxu0 %v1483_v10  ;;  %v835_v10 = vsub.s32 2, %v1942_v21 }
  0xc0   : > { %1008 = vmatpush1.bf16.msra.mxu0 %v1481_v11  ;;  %v836_v11 = vrot.slane %v1945_v23, %v835_v10 }
  0xc1   : > { %1009 = vmatprep.subr.bf16.mxu0 %v1486_v12  ;;  %v840_v12 = vrot.slane %v1947_v24, %v835_v10 }
  0xc4   : > { %1010 = vmatpush1.bf16.msra.mxu0 %v1484_v13 }
  0xc5   : > { %1011 = vmatprep.subr.bf16.mxu0 %v1489_v14 }
  0xc8   : > { %1012 = vmatpush1.bf16.msra.mxu0 %v1487_v15 }
  0xc9   : > { %1013 = vmatprep.subr.bf16.mxu0 %v1492_v16 }
  0xcc   : > { %1014 = vmatpush1.bf16.msra.mxu0 %v1490_v17 }
  0xcd   : > { %1015 = vmatprep.subr.bf16.mxu0 %v1495_v18 }
  0xd0   : > { %1016 = vmatpush1.bf16.msra.mxu0 %v1493_v19 }
  0xd1   : > { %1017 = vmatprep.subr.bf16.mxu0 %v1498_v35 }
  0xd4   : > { %1018 = vmatpush2.bf16.msra.mxu0 %v1496_v36 }
  0xd5   : > { %1019 = vmatprep.subr.bf16.mxu0 %v1501_v37 }
  0xd8   : > { %1020 = vmatpush2.bf16.msra.mxu0 %v1499_v38 }
  0xd9   : > { %1021 = vmatprep.subr.bf16.mxu0 %v1504_v39 }
  0xdc   : > { %1022 = vmatpush2.bf16.msra.mxu0 %v1502_v40 }
  0xdd   : > { %1023 = vmatprep.subr.bf16.mxu0 %v1507_v41 }
  0xe0   : > { %1024 = vmatpush2.bf16.msra.mxu0 %v1505_v42 }
  0xe1   : > { %1025 = vmatprep.subr.bf16.mxu0 %v1510_v43 }
  0xe4   : > { %1026 = vmatpush2.bf16.msra.mxu0 %v1508_v44 }
  0xe5   : > { %1027 = vmatprep.subr.bf16.mxu0 %v1513_v45 }
  0xe8   : > { %1028 = vmatpush2.bf16.msra.mxu0 %v1511_v46 }
  0xe9   : > { %1029 = vmatprep.subr.bf16.mxu0 %v1516_v47 }
  0xec   : > { %1030 = vmatpush2.bf16.msra.mxu0 %v1514_v48 }
  0xed   : > { %1031 = vmatprep.subr.bf16.mxu0 %v1519_v49 }
  0xf0   : > { %1032 = vmatpush2.bf16.msra.mxu0 %v1517_v50 }
 0x173   : > { %v537_v27 = vpop.f32.mrf.mxu0 }
 0x174   : > { %v538_v28 = vadd.f32 %v537_v27, %v338_v25 }
 0x175   : > { %v539_v29 = vpop.f32.mrf.mxu0 }
 0x176   : > { %v540_v30 = vadd.f32 %v539_v29, %v342_v26  ;;  %v544_v33 = vpack.c.bf16 %v538_v28, %v538_v28 }
 0x177   : > { %v541_v31 = vpop.f32.mrf.mxu0 }
 0x178   : > { %v545_v32 = vpack.c.bf16 %v540_v30, %v540_v30 }
 0x179   : > { %v542_v34 = vpop.f32.mrf.mxu0 }
 0x17a   : > { %778 = vmatprep.mubr.bf16.mxu1 %v545_v32 }
 0x17b   : > { %779 = vmatmul.mubr.bf16.vlgmr.msra.gmra.mxu1 %v544_v33 }
 0x23b   : > { %v780_v54 = vpop.f32.mrf.mxu1 }
 0x23c   : > { %v781_v55 = vadd.f32 %v780_v54, %v581_v52 }
 0x23d   : > { %v782_v56 = vpop.f32.mrf.mxu1 }
 0x23e   : > { %v787_v57 = vmul.f32 0.5, %v781_v55  ;;  %v783_v58 = vadd.f32 %v782_v56, %v585_v53 }
 0x23f   : > { %v784_v59 = vpop.f32.mrf.mxu1 }
 0x240   : > { %1520 = vtanh.f32 %v787_v57  ;;  %v788_v60 = vmul.f32 0.5, %v783_v58 }
 0x241   : > { %v785_v61 = vpop.f32.mrf.mxu1 }
 0x242   : > { %1522 = vtanh.f32 %v788_v60 }
 0x24d   : > { %v1521_v62 = vpop.eup %1520 }
 0x24e   : > { %v791_v63 = vmul.f32 0.5, %v1521_v62 }
 0x24f   : > { %v1523_v0 = vpop.eup %1522 }
 0x250   : > { %v793_v1 = vadd.f32 0.5, %v791_v63  ;;  %v792_v2 = vmul.f32 0.5, %v1523_v0 }
 0x252   : > { %v795_v3 = vmul.f32 %v793_v1, %v781_v55  ;;  %v794_v4 = vadd.f32 0.5, %v792_v2 }
 0x254   : > { %v796_v5 = vmul.f32 %v794_v4, %v783_v58  ;;  %v797_v6 = vmul.f32 %v795_v3, %v538_v28 }
 0x256   : > { %v798_v7 = vmul.f32 %v796_v5, %v540_v30  ;;  %v799_v9 = vpack.c.bf16 %v797_v6, %v797_v6 }
 0x258   : > { %v800_v8 = vpack.c.bf16 %v798_v7, %v798_v7 }
 0x25a   : > { %1033 = vmatprep.mubr.bf16.mxu0 %v800_v8 }
 0x25b   : > { %1034 = vmatmul.mubr.bf16.vlgmr.msra.gmra.mxu0 %v799_v9 }
 0x31b   : > { %v1035_v13 = vpop.f32.mrf.mxu0 }
 0x31c   : > { %v1036_v14 = vadd.f32 %v1035_v13, %v836_v11 }
 0x31d   : > { %v1037_v15 = vpop.f32.mrf.mxu0 }
 0x31e   : > { %1042 = vst [vmem:[%s296_s9] sm:$0xff] %v1036_v14  ;;  %v1038_v16 = vadd.f32 %v1037_v15, %v840_v12 }
 0x31f   : > { %v1039_v17 = vpop.f32.mrf.mxu0 }
 0x320   : > { %1043 = vst [vmem:[%s296_s9 + $0x8] sm:$0xff] %v1038_v16 }
 0x321   : > { %v1040_v18 = vpop.f32.mrf.mxu0 }
 0x322   : > { %1669 = shalt.err (!%p1666_p11)
}
 0x323   : > { %s1670_s16 = scalar_lea.hbm %s1963_s27, 256  ;;  %s1674_s30 = scalar_lea.hbm %s2011_s5, 512 }
 0x324   : > { %p1671_p13 = scmp.ne.s32.totalorder %s1963_s27, %s1670_s16  ;;  %p1675_p4 = scmp.lt.s32.totalorder %s1963_s27, %s2011_s5 }
 0x325   : > { %p1676_p6 = scmp.lt.s32.totalorder %s1674_s30, %s1670_s16 }
 0x326   : > { %p1672_p1 = pnand %p1671_p13, %p2029_p7 }
 0x327   : > { %p1677_p5 = por %p1676_p6, %p1675_p4 }
 0x328   : > { %p1673_p3 = pneg %p1672_p1 }
 0x32a   : > { %p1678_p8 = pnand %p1677_p5, %p1673_p3 }
 0x32c   : > { %1681 = shalt.err (!%p1678_p8)
}
 0x32d   : > { %1305 = dma.vmem_to_hbm [thread:$0]  (%p2029_p7), %s1965_s17, 256, %s1963_s27, %s1045_s24  }
 0x32e PF: > { %s1071_s25 = sand.u32 1, %s1716_s18   ;;  %p2030_p10 = scmp.ne.s32.totalorder %s2021_s12, 0 }
 0x32f   : > { %p2031_p0 = scmp.ge.s32.totalorder %s1728_s21, 2  ;;  %s1072_s9 = scalar_lea.sflag [#allocation4], %s1071_s25 }
 0x331   : > { %p1325_p12 = pnand %p2031_p0, %p2030_p10 }
 0x333   : > { %p1326_p2 = pneg %p1325_p12 }
 0x335   : > { %1711 = dma.done.wait (%p1326_p2), %s1072_s9, 256  }
 0x336   : > { %1713 = vsyncadd (%p1326_p2), %s1072_s9, 4294967040  ;;  %p20_p9 = scmp.ge.s32.totalorder %s1857_s28, 4   ;;  %s2032_s18 = smov %s1720_s19 }
 0x337   : > { %s2033_s19 = smov %s1724_s20  ;;  %s2034_s20 = smov %s1868_s7 }
 0x338   : > { %s2035_s21 = smov %s1857_s28  ;;  %22 = sbr.rel (!%p20_p9) target bundleno = 7 (0x7), region = 101 }
 0x33d   :  { %1077 = vsyncpa [#allocation3], 1 }
 0x33e   :  { %1079 = vsyncpa [#allocation3 + $0x1], 1 }
 0x33f   :  { %1080 = vsyncpa [#allocation6], 1 }
 0x340   :  { %1081 = vsyncpa [#allocation9], 1 }
 0x341   :  { %1082 = vsyncpa [#allocation4], 1 }
 0x342   :  { %1084 = vsyncpa [#allocation4 + $0x1], 1 }

// kernel: tpu_custom_call.1
= control target key start
LH: loop header
LB: loop body
LE: loop exit
PB: predicated region body
PF: predicated region fallthrough
CT: control target
= control target key end

     0   :  { %10 = vsyncpa [#allocation3], 0  ;;  %s2006_s0 = inlined_call_operand.hbm [shape: f32[16,256], index: 0, kind: input, shape index: {}]   ;;  %s2007_s1 = inlined_call_operand.hbm [shape: bf16[256,256], index: 1, kind: input, shape index: {}]   ;;  %s2008_s2 = inlined_call_operand.hbm [shape: bf16[256,256], index: 2, kind: input, shape index: {}]   ;;  %s2009_s3 = inlined_call_operand.hbm [shape: bf16[256,256], index: 3, kind: input, shape index: {}]   ;;  %s2010_s4 = inlined_call_operand.hbm [shape: f32[8,256], index: 4, kind: input, shape index: {}]   ;;  %s2011_s5 = inlined_call_operand.hbm [shape: f32[16,256], index: 5, kind: output, shape index: {}]  }
   0x1   :  { %12 = vsyncpa [#allocation3 + $0x1], 0 }
   0x2   :  { %13 = vsyncpa [#allocation6], 0 }
   0x3   :  { %14 = vsyncpa [#allocation9], 0 }
   0x4   :  { %15 = vsyncpa [#allocation4], 0 }
   0x5   :  { %17 = vsyncpa [#allocation4 + $0x1], 0  ;;  %s1768_s18 = smov 0   ;;  %s1770_s19 = smov 0  }
   0x6   :  { %s1772_s20 = smov 0   ;;  %s1774_s21 = smov 0  }
   0x7 LB: > { %s1730_s22 = smov [#allocation5]   ;;  %s1789_s24 = sadd.s32 4294967295, %s1728_s21   ;;  %s1728_s21 = sphi %s1774_s21, %s2035_s21   ;;  %s1724_s20 = sphi %s1772_s20, %s2034_s20   ;;  %s1720_s19 = sphi %s1770_s19, %s2033_s19   ;;  %s1716_s18 = sphi %s1768_s18, %s2032_s18  }
   0x8   : > { %s176_s23 = sshll.u32 %s1730_s22, 4  ;;  %p1168_p0 = scmp.ge.s32.totalorder %s1728_s21, 1  ;;  %s177_s23 = int_to_ptr.vmem [resolvable:$true] %s176_s23 }
   0x9   : > { %p2012_p1 = scmp.eq.s32.totalorder %s1789_s24, 0  ;;  %p164_p2 = scmp.lt.s32.totalorder %s1728_s21, 3 }
   0xa   : > { %s1731_s26 = smov [#allocation8]   ;;  %s1732_s29 = smov [#allocation7]  }
   0xb   : > { %p1794_p3 = pnand %p1168_p0, %p164_p2  ;;  %s202_s27 = sshll.u32 %s1731_s26, 4  ;;  %s1807_s27 = int_to_ptr.vmem [resolvable:$true] %s202_s27 }
   0xc   : > { %s189_s30 = sshll.u32 %s1732_s29, 4  ;;  %s1535_s6 = scalar_lea.vmem %s177_s23, 4096  ;;  %s1809_s30 = int_to_ptr.vmem [resolvable:$true] %s189_s30 }
   0xd   : > { %s2016_s25 = scalar_select %p1794_p3, 1, 0 }
   0xe   : > { %p1307_p5 = pneg %p1794_p3  ;;  %p1536_p8 = scmp.ne.s32.totalorder %s177_s23, %s1535_s6 }
   0xf   : > { %p1543_p11 = scmp.lt.s32.totalorder %s177_s23, %s177_s23  ;;  %p1544_p12 = scmp.lt.s32.totalorder %s1535_s6, %s1535_s6 }
  0x10   : > { %p1803_p6 = pnand %p1307_p5, %p2012_p1 }
  0x11   : > { %p1545_p13 = por %p1544_p12, %p1543_p11 }
  0x12   : > { %p1526_p7 = pneg %p1803_p6 }
  0x14   : > { %p1538_p9 = pnand %p1536_p8, %p1526_p7 }
  0x16   : > { %p1539_p10 = pneg %p1538_p9 }
  0x18   : > { %p1546_p0 = pnand %p1545_p13, %p1539_p10 }
  0x1a   : > { %1549 = shalt.err (!%p1546_p0)
}
  0x1b   : > { %s1733_s7 = smov 128   ;;  %s1734_s8 = smov 8  }
  0x1c   : > { %1310 = dma.hbm_to_vmem [thread:$0]  (!%p1803_p6), %s2007_s1, 4096, %s177_s23, [#allocation6], %s1733_s7, %s1733_s7, %s1734_s8  }
  0x1d   : > { %s1561_s11 = scalar_lea.vmem %s1807_s27, 4096  ;;  %p1569_p9 = scmp.lt.s32.totalorder %s1807_s27, %s1807_s27 }
  0x1e   : > { %p1562_p2 = scmp.ne.s32.totalorder %s1807_s27, %s1561_s11  ;;  %p1570_p10 = scmp.lt.s32.totalorder %s1561_s11, %s1561_s11 }
  0x20   : > { %p1564_p5 = pnand %p1562_p2, %p1526_p7  ;;  %p1571_p11 = por %p1570_p10, %p1569_p9 }
  0x22   : > { %p1565_p8 = pneg %p1564_p5 }
  0x24   : > { %p1572_p12 = pnand %p1571_p11, %p1565_p8 }
  0x26   : > { %1575 = shalt.err (!%p1572_p12)
}
  0x27   : > { %1316 = dma.hbm_to_vmem [thread:$0]  (!%p1803_p6), %s2009_s3, 4096, %s1807_s27, [#allocation9], %s1733_s7, %s1733_s7, %s1734_s8  }
  0x28   : > { %s1587_s14 = scalar_lea.vmem %s1809_s30, 4096  ;;  %p1595_p5 = scmp.lt.s32.totalorder %s1809_s30, %s1809_s30 }
  0x29   : > { %p1588_p13 = scmp.ne.s32.totalorder %s1809_s30, %s1587_s14  ;;  %p1596_p8 = scmp.lt.s32.totalorder %s1587_s14, %s1587_s14 }
  0x2b   : > { %p1590_p0 = pnand %p1588_p13, %p1526_p7  ;;  %p1597_p9 = por %p1596_p8, %p1595_p5 }
  0x2d   : > { %p1591_p2 = pneg %p1590_p0 }
  0x2f   : > { %p1598_p10 = pnand %p1597_p9, %p1591_p2 }
  0x31   : > { %1601 = shalt.err (!%p1598_p10)
}
  0x32   : > { %1313 = dma.hbm_to_vmem [thread:$0]  (!%p1803_p6), %s2008_s2, 4096, %s1809_s30, [#allocation6], %s1733_s7, %s1733_s7, %s1734_s8  }
  0x33   : > { %s1735_s17 = smov [#allocation10]  }
  0x34   : > { %s216_s22 = sshll.u32 %s1735_s17, 4  ;;  %s217_s22 = int_to_ptr.vmem [resolvable:$true] %s216_s22 }
  0x35   : > { %s1613_s23 = scalar_lea.vmem %s217_s22, 256  ;;  %p1621_p0 = scmp.lt.s32.totalorder %s217_s22, %s217_s22 }
  0x36   : > { %p1614_p11 = scmp.ne.s32.totalorder %s217_s22, %s1613_s23  ;;  %p1622_p2 = scmp.lt.s32.totalorder %s1613_s23, %s1613_s23 }
  0x38   : > { %p1616_p12 = pnand %p1614_p11, %p1526_p7  ;;  %p1623_p5 = por %p1622_p2, %p1621_p0 }
  0x3a   : > { %p1617_p13 = pneg %p1616_p12 }
  0x3c   : > { %p1624_p8 = pnand %p1623_p5, %p1617_p13 }
  0x3e   : > { %1627 = shalt.err (!%p1624_p8)
}
  0x3f   : > { %1319 = dma.hbm_to_vmem [thread:$0]  (!%p1803_p6), %s2010_s4, 256, %s217_s22, [#allocation9]  }
  0x40   : > { %s1167_s29 = sadd.s32 4294967294, %s1728_s21   ;;  %s1857_s28 = sadd.s32 1, %s1728_s21  }
  0x41   : > { %s27_s30 = ssub.s32 %s1728_s21, %s1857_s28  ;;  %s30_s6 = sadd.s32 1, %s1724_s20 }
  0x42   : > { %p28_p7 = scmp.eq.s32.totalorder %s27_s30, 0  ;;  %p37_p9 = scmp.ne.s32.totalorder %s1724_s20, %s1720_s19 }
  0x43   : > { %p38_p10 = scmp.eq.s32.totalorder %s1728_s21, 0  ;;  %p43_p11 = scmp.ne.s32.totalorder %s1720_s19, %s1716_s18 }
  0x44   : > { %s1868_s7 = scalar_select %p28_p7, %s1724_s20, %s30_s6  }
  0x45   : > { %p1870_p12 = por %p38_p10, %p37_p9  ;;  %p1876_p6 = por %p2012_p1, %p43_p11 }
  0x46   : > { %p151_p13 = scmp.eq.s32.totalorder %s1789_s24, 1  ;;  %p157_p0 = scmp.eq.s32.totalorder %s1167_s29, 1 }
  0x47   : > { %s2019_s9 = scalar_select %p1876_p6, 1, 0 }
  0x48   : > { %p1332_p2 = scmp.lt.s32.totalorder %s1728_s21, 2  ;;  %s227_s10 = sand.u32 1, %s1724_s20  }
  0x49   : > { %p1883_p5 = por %p151_p13, %p37_p9  ;;  %p1887_p8 = por %p157_p0, %p43_p11 }
  0x4a   : > { %s1174_s13 = sshll.u32 %s227_s10, 4  ;;  %s1285_s14 = sshll.u32 %s1728_s21, 8 }
  0x4b   : > { %s2020_s11 = scalar_select %p1883_p5, 1, 0 }
  0x4c   : > { %s2021_s12 = scalar_select %p1887_p8, 1, 0 }
  0x4d   : > { %s1895_s17 = scalar_lea.hbm %s2006_s0, %s1285_s14  ;;  %s231_s22 = scalar_lea.vmem [#allocation2], %s1174_s13 }
  0x4e   : > { %s239_s23 = sshll.u32 %s231_s22, 4  ;;  %p1899_p7 = pnand %p1332_p2, %p1870_p12  ;;  %s240_s23 = int_to_ptr.vmem [resolvable:$true] %s239_s23 }
  0x4f   : > { %s228_s27 = scalar_lea.sflag [#allocation3], %s227_s10  ;;  %s1628_s29 = scalar_lea.hbm %s1895_s17, 256 }
  0x50   : > { %p1629_p9 = scmp.ne.s32.totalorder %s1895_s17, %s1628_s29  ;;  %p1630_p10 = pneg %p1899_p7 }
  0x51   : > { %s1633_s14 = scalar_lea.hbm %s2006_s0, 512  ;;  %p1634_p0 = scmp.lt.s32.totalorder %s1895_s17, %s2006_s0 }
  0x52   : > { %p1631_p11 = pnand %p1630_p10, %p1629_p9  ;;  %p1635_p12 = scmp.lt.s32.totalorder %s1633_s14, %s1628_s29 }
  0x54   : > { %p1632_p13 = pneg %p1631_p11  ;;  %p1636_p2 = por %p1635_p12, %p1634_p0 }
  0x56   : > { %p1637_p4 = pnand %p1636_p2, %p1632_p13 }
  0x58   : > { %1640 = shalt.err (!%p1637_p4)
}
  0x59   : > { %s1641_s8 = scalar_lea.vmem %s240_s23, 256  ;;  %s1736_s10 = smov [#allocation2]  }
  0x5a   : > { %p1642_p1 = scmp.ne.s32.totalorder %s240_s23, %s1641_s8  ;;  %s1646_s16 = sshll.u32 %s1736_s10, 4  ;;  %s1647_s16 = int_to_ptr.vmem [resolvable:$false] %s1646_s16 }
  0x5b   : > { %s1648_s22 = scalar_lea.vmem %s1647_s16, 512  ;;  %p1649_p9 = scmp.lt.s32.totalorder %s240_s23, %s1647_s16 }
  0x5c   : > { %p1644_p8 = pnand %p1642_p1, %p1630_p10  ;;  %p1650_p11 = scmp.lt.s32.totalorder %s1648_s22, %s1641_s8 }
  0x5e   : > { %p1645_p5 = pneg %p1644_p8  ;;  %p1651_p6 = por %p1650_p11, %p1649_p9 }
  0x60   : > { %p1652_p3 = pnand %p1651_p6, %p1645_p5 }
  0x62   : > { %1655 = shalt.err (!%p1652_p3)
}
  0x63   : > { %1323 = dma.hbm_to_vmem [thread:$0]  (!%p1899_p7), %s1895_s17, 256, %s240_s23, %s228_s27  }
  0x64   : > { %p2023_p13 = scmp.ne.s32.totalorder %s2016_s25, 0 }
  0x65   : > { %s1920_s29 = sand.u32 (!%p2023_p13), 1, %s1720_s19   ;;  %p2024_p1 = scmp.ne.s32.totalorder (!%p2023_p13), %s2019_s9, 0 }
  0x66   : > { %248 = sbr.rel (%p2023_p13) target bundleno = 814 (0x32e), region = 40  ;;  %s1178_s30 = sshll.u32 (!%p2023_p13), %s1920_s29, 4 }
  0x67   : > { %s251_s6 = scalar_lea.sflag (!%p2023_p13), [#allocation3], %s1920_s29  ;;  %s1926_s14 = scalar_lea.vmem (!%p2023_p13), [#allocation2], %s1178_s30 }
  0x6b   : > { %1699 = dma.done.wait (%p2024_p1), %s251_s6, 256  }
  0x6c   : > { %1701 = vsyncadd (%p2024_p1), %s251_s6, 4294967040  ;;  %p2025_p3 = scmp.eq.s32.totalorder %s1789_s24, 0 }
  0x6e   : > { %1703 = dma.done.wait (%p2025_p3), [#allocation6], 8192   ;;  %p2026_p4 = pmov %p2025_p3 }
  0x6f   : > { %p2027_p6 = pmov %p2025_p3 }
  0x70   : > { %1705 = vsyncadd (%p2026_p4), [#allocation6], 4294959104 }
  0x71   : > { %1707 = dma.done.wait (%p2027_p6), [#allocation9], 4352   ;;  %p2028_p5 = pmov %p2025_p3 }
  0x72   : > { %v1376_v0 = vld [vmem:[#allocation5 + $0x74] ss:$8 sps:$4 sm:$0xff]   ;;  %v1378_v1 = vld [vmem:[#allocation5 + $0x70] ss:$8 sps:$4 sm:$0xff]   ;;  %v1379_v2 = vld [vmem:[#allocation5 + $0x64] ss:$8 sps:$4 sm:$0xff]  }
  0x73   : > { %1709 = vsyncadd (%p2028_p5), [#allocation9], 4294962944  ;;  %503 = vmatprep.subr.bf16.mxu0 %v1376_v0  ;;  %v1381_v3 = vld [vmem:[#allocation5 + $0x60] ss:$8 sps:$4 sm:$0xff]   ;;  %v1382_v4 = vld [vmem:[#allocation5 + $0x54] ss:$8 sps:$4 sm:$0xff]  }
  0x74   : > { %504 = vmatpush1.bf16.msra.mxu0 %v1378_v1  ;;  %v1384_v5 = vld [vmem:[#allocation5 + $0x50] ss:$8 sps:$4 sm:$0xff]   ;;  %v1385_v6 = vld [vmem:[#allocation5 + $0x44] ss:$8 sps:$4 sm:$0xff]   ;;  %v1387_v7 = vld [vmem:[#allocation5 + $0x40] ss:$8 sps:$4 sm:$0xff]  }
  0x75   : > { %505 = vmatprep.subr.bf16.mxu0 %v1379_v2  ;;  %v1388_v8 = vld [vmem:[#allocation5 + $0x34] ss:$8 sps:$4 sm:$0xff]   ;;  %v1390_v9 = vld [vmem:[#allocation5 + $0x30] ss:$8 sps:$4 sm:$0xff]   ;;  %v1391_v10 = vld [vmem:[#allocation5 + $0x24] ss:$8 sps:$4 sm:$0xff]  }
  0x76   : > { %v1393_v11 = vld [vmem:[#allocation5 + $0x20] ss:$8 sps:$4 sm:$0xff]   ;;  %v1394_v12 = vld [vmem:[#allocation5 + $0x14] ss:$8 sps:$4 sm:$0xff]   ;;  %v1396_v13 = vld [vmem:[#allocation5 + $0x10] ss:$8 sps:$4 sm:$0xff]  }
  0x77   : > { %v298_v14 = vld [vmem:[%s1926_s14 + $0x8] sm:$0xff]  ;;  %v297_v54 = vld [vmem:[%s1926_s14] sm:$0xff]  ;;  %s1286_s25 = sshll.u32 %s1789_s24, 8  ;;  %s296_s9 = scalar_lea.vmem [#allocation11], %s1178_s30 }
  0x78   : > { %506 = vmatpush1.bf16.msra.mxu0 %v1381_v3  ;;  %v302_v15 = vpack.c.bf16 %v298_v14, %v298_v14  ;;  %v1424_v16 = vld [vmem:[#allocation7 + $0x74] ss:$8 sps:$4 sm:$0xff]   ;;  %v1426_v17 = vld [vmem:[#allocation7 + $0x70] ss:$8 sps:$4 sm:$0xff]   ;;  %v1397_v18 = vld [vmem:[#allocation5 + $0x4] ss:$8 sps:$4 sm:$0xff]   ;;  %v301_v56 = vpack.c.bf16 %v297_v54, %v297_v54  ;;  %s1963_s27 = scalar_lea.hbm %s2011_s5, %s1286_s25 }
  0x79   : > { %507 = vmatprep.subr.bf16.mxu0 %v1382_v4  ;;  %v1427_v19 = vld [vmem:[#allocation7 + $0x64] ss:$8 sps:$4 sm:$0xff]   ;;  %v1399_v20 = vld [vmem:[#allocation5] ss:$8 sps:$4 sm:$0xff]   ;;  %746 = vmatprep.subr.bf16.mxu1 %v1424_v16  ;;  %v1430_v22 = vld [vmem:[#allocation7 + $0x54] ss:$8 sps:$4 sm:$0xff]  }
  0x7a   : > { %535 = vmatprep.mubr.bf16.mxu0 %v302_v15  ;;  %747 = vmatpush1.bf16.msra.mxu1 %v1426_v17  ;;  %v1429_v21 = vld [vmem:[#allocation7 + $0x60] ss:$8 sps:$4 sm:$0xff]   ;;  %v1400_v23 = vld [vmem:[#allocation5 + $0xf4] ss:$8 sps:$4 sm:$0xff]   ;;  %v1402_v24 = vld [vmem:[#allocation5 + $0xf0] ss:$8 sps:$4 sm:$0xff]  }
  0x7b   : > { %748 = vmatprep.subr.bf16.mxu1 %v1427_v19  ;;  %v1432_v25 = vld [vmem:[#allocation7 + $0x50] ss:$8 sps:$4 sm:$0xff]   ;;  %v1433_v26 = vld [vmem:[#allocation7 + $0x44] ss:$8 sps:$4 sm:$0xff]   ;;  %v1405_v28 = vld [vmem:[#allocation5 + $0xe0] ss:$8 sps:$4 sm:$0xff]  }
  0x7c   : > { %508 = vmatpush1.bf16.msra.mxu0 %v1384_v5  ;;  %v1403_v27 = vld [vmem:[#allocation5 + $0xe4] ss:$8 sps:$4 sm:$0xff]   ;;  %v1435_v29 = vld [vmem:[#allocation7 + $0x40] ss:$8 sps:$4 sm:$0xff]   ;;  %v1436_v30 = vld [vmem:[#allocation7 + $0x34] ss:$8 sps:$4 sm:$0xff]  }
  0x7d   : > { %509 = vmatprep.subr.bf16.mxu0 %v1385_v6  ;;  %v1406_v31 = vld [vmem:[#allocation5 + $0xd4] ss:$8 sps:$4 sm:$0xff]   ;;  %v1408_v32 = vld [vmem:[#allocation5 + $0xd0] ss:$8 sps:$4 sm:$0xff]   ;;  %v1439_v34 = vld [vmem:[#allocation7 + $0x24] ss:$8 sps:$4 sm:$0xff]  }
  0x7e   : > { %749 = vmatpush1.bf16.msra.mxu1 %v1429_v21  ;;  %v1438_v33 = vld [vmem:[#allocation7 + $0x30] ss:$8 sps:$4 sm:$0xff]   ;;  %v1409_v35 = vld [vmem:[#allocation5 + $0xc4] ss:$8 sps:$4 sm:$0xff]   ;;  %v1441_v36 = vld [vmem:[#allocation7 + $0x20] ss:$8 sps:$4 sm:$0xff]  }
  0x7f   : > { %750 = vmatprep.subr.bf16.mxu1 %v1430_v22  ;;  %v1411_v37 = vld [vmem:[#allocation5 + $0xc0] ss:$8 sps:$4 sm:$0xff]   ;;  %v1442_v38 = vld [vmem:[#allocation7 + $0x14] ss:$8 sps:$4 sm:$0xff]   ;;  %v1444_v40 = vld [vmem:[#allocation7 + $0x10] ss:$8 sps:$4 sm:$0xff]  }
  0x80   : > { %510 = vmatpush1.bf16.msra.mxu0 %v1387_v7  ;;  %v1412_v39 = vld [vmem:[#allocation5 + $0xb4] ss:$8 sps:$4 sm:$0xff]   ;;  %v1414_v41 = vld [vmem:[#allocation5 + $0xb0] ss:$8 sps:$4 sm:$0xff]   ;;  %v1445_v42 = vld [vmem:[#allocation7 + $0x4] ss:$8 sps:$4 sm:$0xff]  }
  0x81   : > { %511 = vmatprep.subr.bf16.mxu0 %v1388_v8  ;;  %v1415_v43 = vld [vmem:[#allocation5 + $0xa4] ss:$8 sps:$4 sm:$0xff]   ;;  %v1447_v44 = vld [vmem:[#allocation7] ss:$8 sps:$4 sm:$0xff]   ;;  %v1448_v46 = vld [vmem:[#allocation7 + $0xf4] ss:$8 sps:$4 sm:$0xff]  }
  0x82   : > { %751 = vmatpush1.bf16.msra.mxu1 %v1432_v25  ;;  %v1417_v45 = vld [vmem:[#allocation5 + $0xa0] ss:$8 sps:$4 sm:$0xff]   ;;  %v1418_v47 = vld [vmem:[#allocation5 + $0x94] ss:$8 sps:$4 sm:$0xff]   ;;  %v1450_v48 = vld [vmem:[#allocation7 + $0xf0] ss:$8 sps:$4 sm:$0xff]  }
  0x83   : > { %752 = vmatprep.subr.bf16.mxu1 %v1433_v26  ;;  %v1420_v49 = vld [vmem:[#allocation5 + $0x90] ss:$8 sps:$4 sm:$0xff]   ;;  %v1451_v50 = vld [vmem:[#allocation7 + $0xe4] ss:$8 sps:$4 sm:$0xff]   ;;  %v1453_v52 = vld [vmem:[#allocation7 + $0xe0] ss:$8 sps:$4 sm:$0xff]  }
  0x84   : > { %512 = vmatpush1.bf16.msra.mxu0 %v1390_v9  ;;  %v1421_v51 = vld [vmem:[#allocation5 + $0x84] ss:$8 sps:$4 sm:$0xff]   ;;  %v1423_v53 = vld [vmem:[#allocation5 + $0x80] ss:$8 sps:$4 sm:$0xff]   ;;  %v1454_v55 = vld [vmem:[#allocation7 + $0xd4] ss:$8 sps:$4 sm:$0xff]  }
  0x85   : > { %513 = vmatprep.subr.bf16.mxu0 %v1391_v10  ;;  %v1456_v57 = vld [vmem:[#allocation7 + $0xd0] ss:$8 sps:$4 sm:$0xff]   ;;  %v1457_v58 = vld [vmem:[#allocation7 + $0xc4] ss:$8 sps:$4 sm:$0xff]   ;;  %v1459_v59 = vld [vmem:[#allocation7 + $0xc0] ss:$8 sps:$4 sm:$0xff]  }
  0x86   : > { %753 = vmatpush1.bf16.msra.mxu1 %v1435_v29  ;;  %v1460_v60 = vld [vmem:[#allocation7 + $0xb4] ss:$8 sps:$4 sm:$0xff]   ;;  %v1462_v61 = vld [vmem:[#allocation7 + $0xb0] ss:$8 sps:$4 sm:$0xff]   ;;  %v1463_v62 = vld [vmem:[#allocation7 + $0xa4] ss:$8 sps:$4 sm:$0xff]  }
  0x87   : > { %754 = vmatprep.subr.bf16.mxu1 %v1436_v30  ;;  %v1465_v63 = vld [vmem:[#allocation7 + $0xa0] ss:$8 sps:$4 sm:$0xff]   ;;  %v1466_v0 = vld [vmem:[#allocation7 + $0x94] ss:$8 sps:$4 sm:$0xff]   ;;  %v1468_v1 = vld [vmem:[#allocation7 + $0x90] ss:$8 sps:$4 sm:$0xff]  }
  0x88   : > { %514 = vmatpush1.bf16.msra.mxu0 %v1393_v11  ;;  %v1469_v2 = vld [vmem:[#allocation7 + $0x84] ss:$8 sps:$4 sm:$0xff]   ;;  %v1471_v3 = vld [vmem:[#allocation7 + $0x80] ss:$8 sps:$4 sm:$0xff]   ;;  %v1472_v4 = vld [vmem:[#allocation8 + $0x70] ss:$8 sps:$4 sm:$0xff]  }
  0x89   : > { %515 = vmatprep.subr.bf16.mxu0 %v1394_v12  ;;  %v1474_v5 = vld [vmem:[#allocation8 + $0x74] ss:$8 sps:$4 sm:$0xff]   ;;  %v1477_v6 = vld [vmem:[#allocation8 + $0x64] ss:$8 sps:$4 sm:$0xff]   ;;  %v1475_v7 = vld [vmem:[#allocation8 + $0x60] ss:$8 sps:$4 sm:$0xff]  }
  0x8a   : > { %755 = vmatpush1.bf16.msra.mxu1 %v1438_v33  ;;  %v1480_v8 = vld [vmem:[#allocation8 + $0x54] ss:$8 sps:$4 sm:$0xff]   ;;  %v1478_v9 = vld [vmem:[#allocation8 + $0x50] ss:$8 sps:$4 sm:$0xff]   ;;  %v1483_v10 = vld [vmem:[#allocation8 + $0x44] ss:$8 sps:$4 sm:$0xff]  }
  0x8b   : > { %756 = vmatprep.subr.bf16.mxu1 %v1439_v34  ;;  %v1481_v11 = vld [vmem:[#allocation8 + $0x40] ss:$8 sps:$4 sm:$0xff]   ;;  %v1486_v12 = vld [vmem:[#allocation8 + $0x34] ss:$8 sps:$4 sm:$0xff]   ;;  %v1489_v14 = vld [vmem:[#allocation8 + $0x24] ss:$8 sps:$4 sm:$0xff]  }
  0x8c   : > { %516 = vmatpush1.bf16.msra.mxu0 %v1396_v13  ;;  %v1484_v13 = vld [vmem:[#allocation8 + $0x30] ss:$8 sps:$4 sm:$0xff]   ;;  %v1487_v15 = vld [vmem:[#allocation8 + $0x20] ss:$8 sps:$4 sm:$0xff]   ;;  %v1492_v16 = vld [vmem:[#allocation8 + $0x14] ss:$8 sps:$4 sm:$0xff]  }
  0x8d   : > { %517 = vmatprep.subr.bf16.mxu0 %v1397_v18  ;;  %v1490_v17 = vld [vmem:[#allocation8 + $0x10] ss:$8 sps:$4 sm:$0xff]   ;;  %v1495_v18 = vld [vmem:[#allocation8 + $0x4] ss:$8 sps:$4 sm:$0xff]   ;;  %v1493_v19 = vld [vmem:[#allocation8] ss:$8 sps:$4 sm:$0xff]  }
  0x8e   : > { %757 = vmatpush1.bf16.msra.mxu1 %v1441_v36  ;;  %v1496_v36 = vld [vmem:[#allocation8 + $0xf0] ss:$8 sps:$4 sm:$0xff]   ;;  %s1059_s17 = sshll.u32 %s296_s9, 4  ;;  %s1045_s24 = scalar_lea.sflag [#allocation4], %s1920_s29  ;;  %s1965_s17 = int_to_ptr.vmem [resolvable:$true] %s1059_s17 }
  0x8f   : > { %758 = vmatprep.subr.bf16.mxu1 %v1442_v38  ;;  %v1499_v38 = vld [vmem:[#allocation8 + $0xe0] ss:$8 sps:$4 sm:$0xff]   ;;  %s1656_s13 = scalar_lea.vmem %s1965_s17, 256  ;;  %p2029_p7 = scmp.ne.s32.totalorder %s2020_s11, 0 }
  0x90   : > { %518 = vmatpush1.bf16.msra.mxu0 %v1399_v20  ;;  %v335_v20 = vlaneseq  ;;  %p1657_p8 = scmp.ne.s32.totalorder %s1965_s17, %s1656_s13  ;;  %s1737_s15 = smov [#allocation11]  }
  0x91   : > { %519 = vmatprep.subr.bf16.mxu0 %v1400_v23  ;;  %v1945_v23 = vld [vmem:[#allocation10] sm:$0xff]  ;;  %s1660_s8 = sshll.u32 %s1737_s15, 4  ;;  %s1661_s8 = int_to_ptr.vmem [resolvable:$false] %s1660_s8 }
  0x92   : > { %759 = vmatpush1.bf16.msra.mxu1 %v1444_v40  ;;  %v1942_v21 = vshrl.u32 %v335_v20, 7  ;;  %v1502_v40 = vld [vmem:[#allocation8 + $0xd0] ss:$8 sps:$4 sm:$0xff]   ;;  %p1658_p10 = pnand %p1657_p8, %p2029_p7  ;;  %s1662_s10 = scalar_lea.vmem %s1661_s8, 512 }
  0x93   : > { %760 = vmatprep.subr.bf16.mxu1 %v1445_v42  ;;  %v1505_v42 = vld [vmem:[#allocation8 + $0xc0] ss:$8 sps:$4 sm:$0xff]   ;;  %p1663_p12 = scmp.lt.s32.totalorder %s1965_s17, %s1661_s8  ;;  %p1664_p2 = scmp.lt.s32.totalorder %s1662_s10, %s1656_s13 }
  0x94   : > { %520 = vmatpush2.bf16.msra.mxu0 %v1402_v24  ;;  %v337_v22 = vsub.s32 0, %v1942_v21  ;;  %v1947_v24 = vld [vmem:[#allocation10 + $0x8] sm:$0xff]  ;;  %p1659_p0 = pneg %p1658_p10 }
  0x95   : > { %521 = vmatprep.subr.bf16.mxu0 %v1403_v27  ;;  %p1665_p9 = por %p1664_p2, %p1663_p12 }
  0x96   : > { %761 = vmatpush1.bf16.msra.mxu1 %v1447_v44  ;;  %v338_v25 = vrot.slane %v1945_v23, %v337_v22  ;;  %v342_v26 = vrot.slane %v1947_v24, %v337_v22  ;;  %v1508_v44 = vld [vmem:[#allocation8 + $0xb0] ss:$8 sps:$4 sm:$0xff]  }
  0x97   : > { %762 = vmatprep.subr.bf16.mxu1 %v1448_v46  ;;  %v1511_v46 = vld [vmem:[#allocation8 + $0xa0] ss:$8 sps:$4 sm:$0xff]   ;;  %p1666_p11 = pnand %p1665_p9, %p1659_p0 }
  0x98   : > { %522 = vmatpush2.bf16.msra.mxu0 %v1405_v28 }
  0x99   : > { %523 = vmatprep.subr.bf16.mxu0 %v1406_v31 }
  0x9a   : > { %763 = vmatpush2.bf16.msra.mxu1 %v1450_v48  ;;  %v1514_v48 = vld [vmem:[#allocation8 + $0x90] ss:$8 sps:$4 sm:$0xff]  }
  0x9b   : > { %764 = vmatprep.subr.bf16.mxu1 %v1451_v50  ;;  %v1517_v50 = vld [vmem:[#allocation8 + $0x80] ss:$8 sps:$4 sm:$0xff]  }
  0x9c   : > { %524 = vmatpush2.bf16.msra.mxu0 %v1408_v32 }
  0x9d   : > { %525 = vmatprep.subr.bf16.mxu0 %v1409_v35  ;;  %v1498_v35 = vld [vmem:[#allocation8 + $0xf4] ss:$8 sps:$4 sm:$0xff]  }
  0x9e   : > { %765 = vmatpush2.bf16.msra.mxu1 %v1453_v52 }
  0x9f   : > { %766 = vmatprep.subr.bf16.mxu1 %v1454_v55 }
  0xa0   : > { %526 = vmatpush2.bf16.msra.mxu0 %v1411_v37  ;;  %v1501_v37 = vld [vmem:[#allocation8 + $0xe4] ss:$8 sps:$4 sm:$0xff]  }
  0xa1   : > { %527 = vmatprep.subr.bf16.mxu0 %v1412_v39  ;;  %v1504_v39 = vld [vmem:[#allocation8 + $0xd4] ss:$8 sps:$4 sm:$0xff]  }
  0xa2   : > { %767 = vmatpush2.bf16.msra.mxu1 %v1456_v57 }
  0xa3   : > { %768 = vmatprep.subr.bf16.mxu1 %v1457_v58 }
  0xa4   : > { %528 = vmatpush2.bf16.msra.mxu0 %v1414_v41  ;;  %v1507_v41 = vld [vmem:[#allocation8 + $0xc4] ss:$8 sps:$4 sm:$0xff]  }
  0xa5   : > { %529 = vmatprep.subr.bf16.mxu0 %v1415_v43  ;;  %v1510_v43 = vld [vmem:[#allocation8 + $0xb4] ss:$8 sps:$4 sm:$0xff]  }
  0xa6   : > { %769 = vmatpush2.bf16.msra.mxu1 %v1459_v59 }
  0xa7   : > { %770 = vmatprep.subr.bf16.mxu1 %v1460_v60 }
  0xa8   : > { %530 = vmatpush2.bf16.msra.mxu0 %v1417_v45  ;;  %v1513_v45 = vld [vmem:[#allocation8 + $0xa4] ss:$8 sps:$4 sm:$0xff]  }
  0xa9   : > { %531 = vmatprep.subr.bf16.mxu0 %v1418_v47  ;;  %v1516_v47 = vld [vmem:[#allocation8 + $0x94] ss:$8 sps:$4 sm:$0xff]  }
  0xaa   : > { %771 = vmatpush2.bf16.msra.mxu1 %v1462_v61 }
  0xab   : > { %772 = vmatprep.subr.bf16.mxu1 %v1463_v62 }
  0xac   : > { %532 = vmatpush2.bf16.msra.mxu0 %v1420_v49  ;;  %v1519_v49 = vld [vmem:[#allocation8 + $0x84] ss:$8 sps:$4 sm:$0xff]  }
  0xad   : > { %533 = vmatprep.subr.bf16.mxu0 %v1421_v51  ;;  %v580_v51 = vsub.s32 1, %v1942_v21 }
  0xae   : > { %773 = vmatpush2.bf16.msra.mxu1 %v1465_v63 }
  0xaf   : > { %774 = vmatprep.subr.bf16.mxu1 %v1466_v0  ;;  %v581_v52 = vrot.slane %v1945_v23, %v580_v51 }
  0xb0   : > { %534 = vmatpush2.bf16.msra.mxu0 %v1423_v53  ;;  %v585_v53 = vrot.slane %v1947_v24, %v580_v51 }
  0xb1   : > { %1001 = vmatprep.subr.bf16.mxu0 %v1474_v5 }
  0xb2   : > { %775 = vmatpush2.bf16.msra.mxu1 %v1468_v1 }
  0xb3   : > { %536 = vmatmul.mubr.bf16.vlgmr.msra.gmra.mxu0 %v301_v56  ;;  %776 = vmatprep.subr.bf16.mxu1 %v1469_v2 }
  0xb4   : > { %1002 = vmatpush1.bf16.msra.mxu0 %v1472_v4 }
  0xb5   : > { %1003 = vmatprep.subr.bf16.mxu0 %v1477_v6 }
  0xb6   : > { %777 = vmatpush2.bf16.msra.mxu1 %v1471_v3 }
  0xb8   : > { %1004 = vmatpush1.bf16.msra.mxu0 %v1475_v7 }
  0xb9   : > { %1005 = vmatprep.subr.bf16.mxu0 %v1480_v8 }
  0xbc   : > { %1006 = vmatpush1.bf16.msra.mxu0 %v1478_v9 }
  0xbd   : > { %1007 = vmatprep.subr.bf16.mxu0 %v1483_v10  ;;  %v835_v10 = vsub.s32 2, %v1942_v21 }
  0xc0   : > { %1008 = vmatpush1.bf16.msra.mxu0 %v1481_v11  ;;  %v836_v11 = vrot.slane %v1945_v23, %v835_v10 }
  0xc1   : > { %1009 = vmatprep.subr.bf16.mxu0 %v1486_v12  ;;  %v840_v12 = vrot.slane %v1947_v24, %v835_v10 }
  0xc4   : > { %1010 = vmatpush1.bf16.msra.mxu0 %v1484_v13 }
  0xc5   : > { %1011 = vmatprep.subr.bf16.mxu0 %v1489_v14 }
  0xc8   : > { %1012 = vmatpush1.bf16.msra.mxu0 %v1487_v15 }
  0xc9   : > { %1013 = vmatprep.subr.bf16.mxu0 %v1492_v16 }
  0xcc   : > { %1014 = vmatpush1.bf16.msra.mxu0 %v1490_v17 }
  0xcd   : > { %1015 = vmatprep.subr.bf16.mxu0 %v1495_v18 }
  0xd0   : > { %1016 = vmatpush1.bf16.msra.mxu0 %v1493_v19 }
  0xd1   : > { %1017 = vmatprep.subr.bf16.mxu0 %v1498_v35 }
  0xd4   : > { %1018 = vmatpush2.bf16.msra.mxu0 %v1496_v36 }
  0xd5   : > { %1019 = vmatprep.subr.bf16.mxu0 %v1501_v37 }
  0xd8   : > { %1020 = vmatpush2.bf16.msra.mxu0 %v1499_v38 }
  0xd9   : > { %1021 = vmatprep.subr.bf16.mxu0 %v1504_v39 }
  0xdc   : > { %1022 = vmatpush2.bf16.msra.mxu0 %v1502_v40 }
  0xdd   : > { %1023 = vmatprep.subr.bf16.mxu0 %v1507_v41 }
  0xe0   : > { %1024 = vmatpush2.bf16.msra.mxu0 %v1505_v42 }
  0xe1   : > { %1025 = vmatprep.subr.bf16.mxu0 %v1510_v43 }
  0xe4   : > { %1026 = vmatpush2.bf16.msra.mxu0 %v1508_v44 }
  0xe5   : > { %1027 = vmatprep.subr.bf16.mxu0 %v1513_v45 }
  0xe8   : > { %1028 = vmatpush2.bf16.msra.mxu0 %v1511_v46 }
  0xe9   : > { %1029 = vmatprep.subr.bf16.mxu0 %v1516_v47 }
  0xec   : > { %1030 = vmatpush2.bf16.msra.mxu0 %v1514_v48 }
  0xed   : > { %1031 = vmatprep.subr.bf16.mxu0 %v1519_v49 }
  0xf0   : > { %1032 = vmatpush2.bf16.msra.mxu0 %v1517_v50 }
 0x173   : > { %v537_v27 = vpop.f32.mrf.mxu0 }
 0x174   : > { %v538_v28 = vadd.f32 %v537_v27, %v338_v25 }
 0x175   : > { %v539_v29 = vpop.f32.mrf.mxu0 }
 0x176   : > { %v540_v30 = vadd.f32 %v539_v29, %v342_v26  ;;  %v544_v33 = vpack.c.bf16 %v538_v28, %v538_v28 }
 0x177   : > { %v541_v31 = vpop.f32.mrf.mxu0 }
 0x178   : > { %v545_v32 = vpack.c.bf16 %v540_v30, %v540_v30 }
 0x179   : > { %v542_v34 = vpop.f32.mrf.mxu0 }
 0x17a   : > { %778 = vmatprep.mubr.bf16.mxu1 %v545_v32 }
 0x17b   : > { %779 = vmatmul.mubr.bf16.vlgmr.msra.gmra.mxu1 %v544_v33 }
 0x23b   : > { %v780_v54 = vpop.f32.mrf.mxu1 }
 0x23c   : > { %v781_v55 = vadd.f32 %v780_v54, %v581_v52 }
 0x23d   : > { %v782_v56 = vpop.f32.mrf.mxu1 }
 0x23e   : > { %v787_v57 = vmul.f32 0.5, %v781_v55  ;;  %v783_v58 = vadd.f32 %v782_v56, %v585_v53 }
 0x23f   : > { %v784_v59 = vpop.f32.mrf.mxu1 }
 0x240   : > { %1520 = vtanh.f32 %v787_v57  ;;  %v788_v60 = vmul.f32 0.5, %v783_v58 }
 0x241   : > { %v785_v61 = vpop.f32.mrf.mxu1 }
 0x242   : > { %1522 = vtanh.f32 %v788_v60 }
 0x24d   : > { %v1521_v62 = vpop.eup %1520 }
 0x24e   : > { %v791_v63 = vmul.f32 0.5, %v1521_v62 }
 0x24f   : > { %v1523_v0 = vpop.eup %1522 }
 0x250   : > { %v793_v1 = vadd.f32 0.5, %v791_v63  ;;  %v792_v2 = vmul.f32 0.5, %v1523_v0 }
 0x252   : > { %v795_v3 = vmul.f32 %v793_v1, %v781_v55  ;;  %v794_v4 = vadd.f32 0.5, %v792_v2 }
 0x254   : > { %v796_v5 = vmul.f32 %v794_v4, %v783_v58  ;;  %v797_v6 = vmul.f32 %v795_v3, %v538_v28 }
 0x256   : > { %v798_v7 = vmul.f32 %v796_v5, %v540_v30  ;;  %v799_v9 = vpack.c.bf16 %v797_v6, %v797_v6 }
 0x258   : > { %v800_v8 = vpack.c.bf16 %v798_v7, %v798_v7 }
 0x25a   : > { %1033 = vmatprep.mubr.bf16.mxu0 %v800_v8 }
 0x25b   : > { %1034 = vmatmul.mubr.bf16.vlgmr.msra.gmra.mxu0 %v799_v9 }
 0x31b   : > { %v1035_v13 = vpop.f32.mrf.mxu0 }
 0x31c   : > { %v1036_v14 = vadd.f32 %v1035_v13, %v836_v11 }
 0x31d   : > { %v1037_v15 = vpop.f32.mrf.mxu0 }
 0x31e   : > { %1042 = vst [vmem:[%s296_s9] sm:$0xff] %v1036_v14  ;;  %v1038_v16 = vadd.f32 %v1037_v15, %v840_v12 }
 0x31f   : > { %v1039_v17 = vpop.f32.mrf.mxu0 }
 0x320   : > { %1043 = vst [vmem:[%s296_s9 + $0x8] sm:$0xff] %v1038_v16 }
 0x321   : > { %v1040_v18 = vpop.f32.mrf.mxu0 }
 0x322   : > { %1669 = shalt.err (!%p1666_p11)
}
 0x323   : > { %s1670_s16 = scalar_lea.hbm %s1963_s27, 256  ;;  %s1674_s30 = scalar_lea.hbm %s2011_s5, 512 }
 0x324   : > { %p1671_p13 = scmp.ne.s32.totalorder %s1963_s27, %s1670_s16  ;;  %p1675_p4 = scmp.lt.s32.totalorder %s1963_s27, %s2011_s5 }
 0x325   : > { %p1676_p6 = scmp.lt.s32.totalorder %s1674_s30, %s1670_s16 }
 0x326   : > { %p1672_p1 = pnand %p1671_p13, %p2029_p7 }
 0x327   : > { %p1677_p5 = por %p1676_p6, %p1675_p4 }
 0x328   : > { %p1673_p3 = pneg %p1672_p1 }
 0x32a   : > { %p1678_p8 = pnand %p1677_p5, %p1673_p3 }
 0x32c   : > { %1681 = shalt.err (!%p1678_p8)
}
 0x32d   : > { %1305 = dma.vmem_to_hbm [thread:$0]  (%p2029_p7), %s1965_s17, 256, %s1963_s27, %s1045_s24  }
 0x32e PF: > { %s1071_s25 = sand.u32 1, %s1716_s18   ;;  %p2030_p10 = scmp.ne.s32.totalorder %s2021_s12, 0 }
 0x32f   : > { %p2031_p0 = scmp.ge.s32.totalorder %s1728_s21, 2  ;;  %s1072_s9 = scalar_lea.sflag [#allocation4], %s1071_s25 }
 0x331   : > { %p1325_p12 = pnand %p2031_p0, %p2030_p10 }
 0x333   : > { %p1326_p2 = pneg %p1325_p12 }
 0x335   : > { %1711 = dma.done.wait (%p1326_p2), %s1072_s9, 256  }
 0x336   : > { %1713 = vsyncadd (%p1326_p2), %s1072_s9, 4294967040  ;;  %p20_p9 = scmp.ge.s32.totalorder %s1857_s28, 4   ;;  %s2032_s18 = smov %s1720_s19 }
 0x337   : > { %s2033_s19 = smov %s1724_s20  ;;  %s2034_s20 = smov %s1868_s7 }
 0x338   : > { %s2035_s21 = smov %s1857_s28  ;;  %22 = sbr.rel (!%p20_p9) target bundleno = 7 (0x7), region = 101 }
 0x33d   :  { %1077 = vsyncpa [#allocation3], 1 }
 0x33e   :  { %1079 = vsyncpa [#allocation3 + $0x1], 1 }
 0x33f   :  { %1080 = vsyncpa [#allocation6], 1 }
 0x340   :  { %1081 = vsyncpa [#allocation9], 1 }
 0x341   :  { %1082 = vsyncpa [#allocation4], 1 }
 0x342   :  { %1084 = vsyncpa [#allocation4 + $0x1], 1 }

</bundles_post_ra>
